<compile_context>
chip_gen: v5e
topology: v5e:2x2
jax: 0.10.0
libtpu: 0.0.40
codegen_flags: <defaults>
</compile_context>

<pallas_src>
import math
import functools

import jax
import jax.numpy as jnp
from jax import lax
from jax.experimental import pallas as pl
from jax.experimental.pallas import tpu as pltpu

# ---- small, self-consistent config -----------------------------------------
N_TOKENS = 256     # vocab size
D_MODEL = 32       # d_model
N_HEAD = 4         # attention heads (d_head = 8)
D_FF = 64          # transformer feed-forward dim
N_LAYERS = 2       # encoder layers
EPS = 1e-5         # nn.LayerNorm default eps
MAX_LEN = 512      # positional-encoding table length

VMEM = pltpu.MemorySpace.VMEM

LAYER_KEYS = ('in_proj_w', 'in_proj_b', 'out_proj_w', 'out_proj_b',
              'ln1_g', 'ln1_b', 'ff_w1', 'ff_b1', 'ff_w2', 'ff_b2',
              'ln2_g', 'ln2_b')
_REFS_PER_LAYER = len(LAYER_KEYS)   # 12


# ---------------------------- fused Pallas kernel -----------------------------
def _fused_forward_kernel(*refs, B, L, H, n_layers):
    """Whole CodeMLM forward (post token-embedding gather) in one kernel.

    refs = [x, embedding,
            n_layers * (12 layer weights),
            final_ln_g, final_ln_b, head_w, head_b, head_ln_g, head_ln_b,
            out_ref, attn_scratch]
    """
    x_ref, emb_ref = refs[0], refs[1]
    layer_refs = refs[2:2 + n_layers * _REFS_PER_LAYER]
    (fin_g, fin_b, head_w, head_b,
     head_g, head_beta) = refs[2 + n_layers * _REFS_PER_LAYER:-2]
    out_ref = refs[-2]
    attn_scr = refs[-1]                      # VMEM scratch (M, D)

    D = x_ref.shape[1]
    dh = D // H

    def layernorm(h, g_ref, b_ref):
        mu = jnp.mean(h, axis=-1, keepdims=True)
        var = jnp.mean(jnp.square(h - mu), axis=-1, keepdims=True)
        return (h - mu) * lax.rsqrt(var + EPS) * g_ref[...] + b_ref[...]

    x = x_ref[...]                                                    # (M, D) f32

    for li in range(n_layers):
        (w_qkv, b_qkv, w_o, b_o, g1, be1,
         w1, b1, w2, b2, g2, be2) = layer_refs[li * _REFS_PER_LAYER:
                                               (li + 1) * _REFS_PER_LAYER]

        # fused QKV projection; kept as a single (M, 3D) slab (weights are
        # pre-transposed to (in, out) -> plain matmul, no in-kernel .T).
        qkv = jnp.dot(x, w_qkv[...], preferred_element_type=jnp.float32) + b_qkv[...]

        # multi-head self-attention (Q already pre-scaled by 1/sqrt(dh)).
        for b in range(B):
            r0 = b * L
            for h in range(H):
                c = h * dh
                q_bh = qkv[r0:r0 + L, c:c + dh]
                k_bh = qkv[r0:r0 + L, D + c:D + c + dh]
                v_bh = qkv[r0:r0 + L, 2 * D + c:2 * D + c + dh]
                # q @ k^T via dot_general contracting the last dim of both.
                s = lax.dot_general(q_bh, k_bh, (((1,), (1,)), ((), ())),
                                    preferred_element_type=jnp.float32)
                m = jnp.max(s, axis=-1, keepdims=True)
                p = jnp.exp(s - m)
                denom = jnp.sum(p, axis=-1, keepdims=True)
                p = p * pl.reciprocal(denom, approx=True)
                attn_scr[r0:r0 + L, c:c + dh] = jnp.dot(
                    p, v_bh, preferred_element_type=jnp.float32)

        attn = jnp.dot(attn_scr[...], w_o[...],
                       preferred_element_type=jnp.float32) + b_o[...]
        x = layernorm(x + attn, g1, be1)                       # post-LN block 1

        ff = jnp.maximum(
            jnp.dot(x, w1[...], preferred_element_type=jnp.float32) + b1[...], 0.0)
        ff = jnp.dot(ff, w2[...], preferred_element_type=jnp.float32) + b2[...]
        x = layernorm(x + ff, g2, be2)                         # post-LN block 2

    # final encoder LayerNorm (TransformerEncoder norm=LayerNorm(d_model))
    x = layernorm(x, fin_g, fin_b)

    # CodeMLM head: Linear -> ReLU -> LayerNorm (fused)
    feats = jnp.maximum(
        jnp.dot(x, head_w[...], preferred_element_type=jnp.float32) + head_b[...],
        0.0)
    feats = layernorm(feats, head_g, head_beta)

    # tied output embedding: logits = feats @ E^T  (lane-dense 256-wide output)
    out_ref[...] = lax.dot_general(feats, emb_ref[...], (((1,), (1,)), ((), ())),
                                   preferred_element_type=jnp.float32)


# ------------------------------ plain-JAX glue --------------------------------
def sinusoidal_pe(max_len, d):
    pos = jnp.arange(max_len, dtype=jnp.float32)[:, None]
    div = jnp.exp(jnp.arange(0, d, 2, dtype=jnp.float32) * (-math.log(10000.0) / d))
    pe = jnp.zeros((max_len, d), jnp.float32)
    pe = pe.at[:, 0::2].set(jnp.sin(pos * div))
    pe = pe.at[:, 1::2].set(jnp.cos(pos * div))
    return pe


def init_params(key):
    """Parameters in PyTorch conventions (nn.Linear weight = (out, in))."""
    keys = iter(jax.random.split(key, 64))

    def nrm(shape, scale=0.02):
        return (scale * jax.random.normal(next(keys), shape)).astype(jnp.float32)

    params = {
        'embedding': nrm((N_TOKENS, D_MODEL), 1.0 / math.sqrt(D_MODEL)),
        'layers': [],
        'final_ln_g': jnp.ones((D_MODEL,), jnp.float32),
        'final_ln_b': jnp.zeros((D_MODEL,), jnp.float32),
        'head_w': nrm((D_MODEL, D_MODEL)),
        'head_b': jnp.zeros((D_MODEL,), jnp.float32),
        'head_ln_g': jnp.ones((D_MODEL,), jnp.float32),
        'head_ln_b': jnp.zeros((D_MODEL,), jnp.float32),
    }
    for _ in range(N_LAYERS):
        params['layers'].append({
            'in_proj_w': nrm((3 * D_MODEL, D_MODEL)),
            'in_proj_b': jnp.zeros((3 * D_MODEL,), jnp.float32),
            'out_proj_w': nrm((D_MODEL, D_MODEL)),
            'out_proj_b': jnp.zeros((D_MODEL,), jnp.float32),
            'ln1_g': jnp.ones((D_MODEL,), jnp.float32),
            'ln1_b': jnp.zeros((D_MODEL,), jnp.float32),
            'ff_w1': nrm((D_FF, D_MODEL)),
            'ff_b1': jnp.zeros((D_FF,), jnp.float32),
            'ff_w2': nrm((D_MODEL, D_FF)),
            'ff_b2': jnp.zeros((D_MODEL,), jnp.float32),
            'ln2_g': jnp.ones((D_MODEL,), jnp.float32),
            'ln2_b': jnp.zeros((D_MODEL,), jnp.float32),
        })
    return params


def prepare_params(params):
    """One-time layout plumbing: transpose weights to (in, out), reshape biases
    to (1, N), fold sqrt(D) into a scaled embedding copy and 1/sqrt(dh) into
    the Q rows of each in_proj, precompute the positional-encoding table."""
    D = D_MODEL
    dh = D // N_HEAD
    inv = jnp.float32(1.0 / math.sqrt(dh))

    prepped = {
        'embedding': params['embedding'],                               # (V, D), tied logits weight
        'emb_scaled': params['embedding'] * jnp.float32(math.sqrt(D)),  # encoder input table
        'pe': sinusoidal_pe(MAX_LEN, D),
        'final_ln_g': params['final_ln_g'].reshape(1, D),
        'final_ln_b': params['final_ln_b'].reshape(1, D),
        'head_w': params['head_w'].T,                                   # (D, D) in->out
        'head_b': params['head_b'].reshape(1, D),
        'head_ln_g': params['head_ln_g'].reshape(1, D),
        'head_ln_b': params['head_ln_b'].reshape(1, D),
        'layers': [],
    }
    for lp in params['layers']:
        w_in = lp['in_proj_w'].at[:D].multiply(inv)   # fold attention scale into Q
        b_in = lp['in_proj_b'].at[:D].multiply(inv)
        prepped['layers'].append({
            'in_proj_w': w_in.T,                       # (D, 3D)
            'in_proj_b': b_in.reshape(1, 3 * D),
            'out_proj_w': lp['out_proj_w'].T,          # (D, D)
            'out_proj_b': lp['out_proj_b'].reshape(1, D),
            'ln1_g': lp['ln1_g'].reshape(1, D),
            'ln1_b': lp['ln1_b'].reshape(1, D),
            'ff_w1': lp['ff_w1'].T,                    # (D, D_FF)
            'ff_b1': lp['ff_b1'].reshape(1, D_FF),
            'ff_w2': lp['ff_w2'].T,                    # (D_FF, D)
            'ff_b2': lp['ff_b2'].reshape(1, D),
            'ln2_g': lp['ln2_g'].reshape(1, D),
            'ln2_b': lp['ln2_b'].reshape(1, D),
        })
    return prepped


def _forward_impl(prepped, im, lengths):
    """im: (B, L) int32 token ids; lengths unused (pad_id=None)."""
    del lengths
    B, L = im.shape
    D = D_MODEL

    # token embedding (sqrt(D) pre-folded) + positional encoding; batch-major rows
    x = prepped['emb_scaled'][im] + prepped['pe'][:L][None, :, :]       # (B, L, D)
    x = x.reshape(B * L, D)

    flat = [x, prepped['embedding']]
    for lp in prepped['layers']:
        flat.extend(lp[k] for k in LAYER_KEYS)
    flat.extend([prepped['final_ln_g'], prepped['final_ln_b'],
                 prepped['head_w'], prepped['head_b'],
                 prepped['head_ln_g'], prepped['head_ln_b']])

    logits = pl.pallas_call(
        functools.partial(_fused_forward_kernel, B=B, L=L, H=N_HEAD,
                          n_layers=N_LAYERS),
        out_shape=jax.ShapeDtypeStruct((B * L, N_TOKENS), jnp.float32),
        in_specs=[pl.BlockSpec(memory_space=VMEM)] * len(flat),
        out_specs=pl.BlockSpec(memory_space=VMEM),
        scratch_shapes=[pltpu.VMEM((B * L, D), jnp.float32)],
    )(*flat)

    # batch-major rows => direct (B, L, V); matches torch.transpose(logits, 0, 1)
    return logits.reshape(B, L, N_TOKENS)


code_mlm_forward = jax.jit(_forward_impl)

# TODO(synk): no key-padding-mask path (pad_id=None in this config); bf16 MXU
# operands and an M-row grid / flash attention only matter once B*L scales up.


if __name__ == "__main__":
    key = jax.random.PRNGKey(0)
    pkey, ikey = jax.random.split(key)
    params = init_params(pkey)
    prepped = prepare_params(params)

    B, L = 2, 8
    im = jax.random.randint(ikey, (B, L), 0, N_TOKENS, dtype=jnp.int32)
    lengths = jnp.full((B,), L, dtype=jnp.int32)

    out = code_mlm_forward(prepped, im, lengths)
    jax.block_until_ready(out)
    assert out.shape == (B, L, N_TOKENS), out.shape
    assert out.dtype == jnp.float32
    assert bool(jnp.all(jnp.isfinite(out)))
    print("KERNEL_OK")
</pallas_src>

<mosaic_0001>
module attributes {stable_mosaic.version = 11 : i64} {
  func.func @_fused_forward_kernel(%arg0: memref<16x32xf32, #tpu.memory_space<vmem>>, %arg1: memref<256x32xf32, #tpu.memory_space<vmem>>, %arg2: memref<32x96xf32, #tpu.memory_space<vmem>>, %arg3: memref<1x96xf32, #tpu.memory_space<vmem>>, %arg4: memref<32x32xf32, #tpu.memory_space<vmem>>, %arg5: memref<1x32xf32, #tpu.memory_space<vmem>>, %arg6: memref<1x32xf32, #tpu.memory_space<vmem>>, %arg7: memref<1x32xf32, #tpu.memory_space<vmem>>, %arg8: memref<32x64xf32, #tpu.memory_space<vmem>>, %arg9: memref<1x64xf32, #tpu.memory_space<vmem>>, %arg10: memref<64x32xf32, #tpu.memory_space<vmem>>, %arg11: memref<1x32xf32, #tpu.memory_space<vmem>>, %arg12: memref<1x32xf32, #tpu.memory_space<vmem>>, %arg13: memref<1x32xf32, #tpu.memory_space<vmem>>, %arg14: memref<32x96xf32, #tpu.memory_space<vmem>>, %arg15: memref<1x96xf32, #tpu.memory_space<vmem>>, %arg16: memref<32x32xf32, #tpu.memory_space<vmem>>, %arg17: memref<1x32xf32, #tpu.memory_space<vmem>>, %arg18: memref<1x32xf32, #tpu.memory_space<vmem>>, %arg19: memref<1x32xf32, #tpu.memory_space<vmem>>, %arg20: memref<32x64xf32, #tpu.memory_space<vmem>>, %arg21: memref<1x64xf32, #tpu.memory_space<vmem>>, %arg22: memref<64x32xf32, #tpu.memory_space<vmem>>, %arg23: memref<1x32xf32, #tpu.memory_space<vmem>>, %arg24: memref<1x32xf32, #tpu.memory_space<vmem>>, %arg25: memref<1x32xf32, #tpu.memory_space<vmem>>, %arg26: memref<1x32xf32, #tpu.memory_space<vmem>>, %arg27: memref<1x32xf32, #tpu.memory_space<vmem>>, %arg28: memref<32x32xf32, #tpu.memory_space<vmem>>, %arg29: memref<1x32xf32, #tpu.memory_space<vmem>>, %arg30: memref<1x32xf32, #tpu.memory_space<vmem>>, %arg31: memref<1x32xf32, #tpu.memory_space<vmem>>, %arg32: memref<16x256xf32, #tpu.memory_space<vmem>>, %arg33: memref<16x32xf32, #tpu.memory_space<vmem>>) attributes {dimension_semantics = [], scalar_prefetch = 0 : i64, scratch_operands = 1 : i64, tpu.core_type = #tpu.core_type<tc>} {
    %c0 = arith.constant 0 : index
    %c0_0 = arith.constant 0 : index
    %0 = vector.load %arg0[%c0, %c0_0] : memref<16x32xf32, #tpu.memory_space<vmem>>, vector<16x32xf32>
    %c0_1 = arith.constant 0 : index
    %c0_2 = arith.constant 0 : index
    %1 = vector.load %arg2[%c0_1, %c0_2] : memref<32x96xf32, #tpu.memory_space<vmem>>, vector<32x96xf32>
    %cst = arith.constant dense<0.000000e+00> : vector<16x96xf32>
    %2 = tpu.matmul %0, %1, %cst {dimension_numbers = #tpu.dot_dimension_numbers<[1], [0], [0], [1], [0, 0, 1, 1], [], []>} : vector<16x32xf32>, vector<32x96xf32>, vector<16x96xf32> -> vector<16x96xf32>
    %c0_3 = arith.constant 0 : index
    %c0_4 = arith.constant 0 : index
    %3 = vector.load %arg3[%c0_3, %c0_4] : memref<1x96xf32, #tpu.memory_space<vmem>>, vector<1x96xf32>
    %4 = vector.broadcast %3 : vector<1x96xf32> to vector<16x96xf32>
    %5 = arith.addf %2, %4 : vector<16x96xf32>
    %6 = vector.extract_strided_slice %5 {offsets = [0, 0], sizes = [8, 8], strides = [1, 1]} : vector<16x96xf32> to vector<8x8xf32>
    %7 = vector.extract_strided_slice %5 {offsets = [0, 32], sizes = [8, 8], strides = [1, 1]} : vector<16x96xf32> to vector<8x8xf32>
    %8 = vector.extract_strided_slice %5 {offsets = [0, 64], sizes = [8, 8], strides = [1, 1]} : vector<16x96xf32> to vector<8x8xf32>
    %cst_5 = arith.constant dense<0.000000e+00> : vector<8x8xf32>
    %9 = tpu.matmul %6, %7, %cst_5 {dimension_numbers = #tpu.dot_dimension_numbers<[1], [1], [0], [0], [0, 0, 1, 0], [], []>} : vector<8x8xf32>, vector<8x8xf32>, vector<8x8xf32> -> vector<8x8xf32>
    %cst_6 = arith.constant dense<0xFF800000> : vector<8xf32>
    %10 = vector.multi_reduction <maximumf>, %9, %cst_6 [1] : vector<8x8xf32> to vector<8xf32>
    %11 = vector.shape_cast %10 : vector<8xf32> to vector<8x1xf32>
    %12 = vector.broadcast %11 : vector<8x1xf32> to vector<8x8xf32>
    %13 = arith.subf %9, %12 : vector<8x8xf32>
    %14 = math.exp %13 : vector<8x8xf32>
    %cst_7 = arith.constant dense<0.000000e+00> : vector<8xf32>
    %15 = vector.multi_reduction <add>, %14, %cst_7 [1] : vector<8x8xf32> to vector<8xf32>
    %16 = vector.shape_cast %15 : vector<8xf32> to vector<8x1xf32>
    %17 = tpu.reciprocal %16 {approx = true} : vector<8x1xf32> -> vector<8x1xf32>
    %18 = vector.broadcast %17 : vector<8x1xf32> to vector<8x8xf32>
    %19 = arith.mulf %14, %18 : vector<8x8xf32>
    %cst_8 = arith.constant dense<0.000000e+00> : vector<8x8xf32>
    %20 = tpu.matmul %19, %8, %cst_8 {dimension_numbers = #tpu.dot_dimension_numbers<[1], [0], [0], [1], [0, 0, 1, 1], [], []>} : vector<8x8xf32>, vector<8x8xf32>, vector<8x8xf32> -> vector<8x8xf32>
    %c0_9 = arith.constant 0 : index
    %c0_10 = arith.constant 0 : index
    %21 = vector.load %arg33[%c0_9, %c0_10] : memref<16x32xf32, #tpu.memory_space<vmem>>, vector<8x8xf32>
    tpu.vector_store %arg33[%c0_9, %c0_10], %20 {strides = array<i32>} : memref<16x32xf32, #tpu.memory_space<vmem>>, vector<8x8xf32>,
    %22 = vector.extract_strided_slice %5 {offsets = [0, 8], sizes = [8, 8], strides = [1, 1]} : vector<16x96xf32> to vector<8x8xf32>
    %23 = vector.extract_strided_slice %5 {offsets = [0, 40], sizes = [8, 8], strides = [1, 1]} : vector<16x96xf32> to vector<8x8xf32>
    %24 = vector.extract_strided_slice %5 {offsets = [0, 72], sizes = [8, 8], strides = [1, 1]} : vector<16x96xf32> to vector<8x8xf32>
    %cst_11 = arith.constant dense<0.000000e+00> : vector<8x8xf32>
    %25 = tpu.matmul %22, %23, %cst_11 {dimension_numbers = #tpu.dot_dimension_numbers<[1], [1], [0], [0], [0, 0, 1, 0], [], []>} : vector<8x8xf32>, vector<8x8xf32>, vector<8x8xf32> -> vector<8x8xf32>
    %cst_12 = arith.constant dense<0xFF800000> : vector<8xf32>
    %26 = vector.multi_reduction <maximumf>, %25, %cst_12 [1] : vector<8x8xf32> to vector<8xf32>
    %27 = vector.shape_cast %26 : vector<8xf32> to vector<8x1xf32>
    %28 = vector.broadcast %27 : vector<8x1xf32> to vector<8x8xf32>
    %29 = arith.subf %25, %28 : vector<8x8xf32>
    %30 = math.exp %29 : vector<8x8xf32>
    %cst_13 = arith.constant dense<0.000000e+00> : vector<8xf32>
    %31 = vector.multi_reduction <add>, %30, %cst_13 [1] : vector<8x8xf32> to vector<8xf32>
    %32 = vector.shape_cast %31 : vector<8xf32> to vector<8x1xf32>
    %33 = tpu.reciprocal %32 {approx = true} : vector<8x1xf32> -> vector<8x1xf32>
    %34 = vector.broadcast %33 : vector<8x1xf32> to vector<8x8xf32>
    %35 = arith.mulf %30, %34 : vector<8x8xf32>
    %cst_14 = arith.constant dense<0.000000e+00> : vector<8x8xf32>
    %36 = tpu.matmul %35, %24, %cst_14 {dimension_numbers = #tpu.dot_dimension_numbers<[1], [0], [0], [1], [0, 0, 1, 1], [], []>} : vector<8x8xf32>, vector<8x8xf32>, vector<8x8xf32> -> vector<8x8xf32>
    %c0_15 = arith.constant 0 : index
    %c8 = arith.constant 8 : index
    %37 = vector.load %arg33[%c0_15, %c8] : memref<16x32xf32, #tpu.memory_space<vmem>>, vector<8x8xf32>
    tpu.vector_store %arg33[%c0_15, %c8], %36 {strides = array<i32>} : memref<16x32xf32, #tpu.memory_space<vmem>>, vector<8x8xf32>,
    %38 = vector.extract_strided_slice %5 {offsets = [0, 16], sizes = [8, 8], strides = [1, 1]} : vector<16x96xf32> to vector<8x8xf32>
    %39 = vector.extract_strided_slice %5 {offsets = [0, 48], sizes = [8, 8], strides = [1, 1]} : vector<16x96xf32> to vector<8x8xf32>
    %40 = vector.extract_strided_slice %5 {offsets = [0, 80], sizes = [8, 8], strides = [1, 1]} : vector<16x96xf32> to vector<8x8xf32>
    %cst_16 = arith.constant dense<0.000000e+00> : vector<8x8xf32>
    %41 = tpu.matmul %38, %39, %cst_16 {dimension_numbers = #tpu.dot_dimension_numbers<[1], [1], [0], [0], [0, 0, 1, 0], [], []>} : vector<8x8xf32>, vector<8x8xf32>, vector<8x8xf32> -> vector<8x8xf32>
    %cst_17 = arith.constant dense<0xFF800000> : vector<8xf32>
    %42 = vector.multi_reduction <maximumf>, %41, %cst_17 [1] : vector<8x8xf32> to vector<8xf32>
    %43 = vector.shape_cast %42 : vector<8xf32> to vector<8x1xf32>
    %44 = vector.broadcast %43 : vector<8x1xf32> to vector<8x8xf32>
    %45 = arith.subf %41, %44 : vector<8x8xf32>
    %46 = math.exp %45 : vector<8x8xf32>
    %cst_18 = arith.constant dense<0.000000e+00> : vector<8xf32>
    %47 = vector.multi_reduction <add>, %46, %cst_18 [1] : vector<8x8xf32> to vector<8xf32>
    %48 = vector.shape_cast %47 : vector<8xf32> to vector<8x1xf32>
    %49 = tpu.reciprocal %48 {approx = true} : vector<8x1xf32> -> vector<8x1xf32>
    %50 = vector.broadcast %49 : vector<8x1xf32> to vector<8x8xf32>
    %51 = arith.mulf %46, %50 : vector<8x8xf32>
    %cst_19 = arith.constant dense<0.000000e+00> : vector<8x8xf32>
    %52 = tpu.matmul %51, %40, %cst_19 {dimension_numbers = #tpu.dot_dimension_numbers<[1], [0], [0], [1], [0, 0, 1, 1], [], []>} : vector<8x8xf32>, vector<8x8xf32>, vector<8x8xf32> -> vector<8x8xf32>
    %c0_20 = arith.constant 0 : index
    %c16 = arith.constant 16 : index
    %53 = vector.load %arg33[%c0_20, %c16] : memref<16x32xf32, #tpu.memory_space<vmem>>, vector<8x8xf32>
    tpu.vector_store %arg33[%c0_20, %c16], %52 {strides = array<i32>} : memref<16x32xf32, #tpu.memory_space<vmem>>, vector<8x8xf32>,
    %54 = vector.extract_strided_slice %5 {offsets = [0, 24], sizes = [8, 8], strides = [1, 1]} : vector<16x96xf32> to vector<8x8xf32>
    %55 = vector.extract_strided_slice %5 {offsets = [0, 56], sizes = [8, 8], strides = [1, 1]} : vector<16x96xf32> to vector<8x8xf32>
    %56 = vector.extract_strided_slice %5 {offsets = [0, 88], sizes = [8, 8], strides = [1, 1]} : vector<16x96xf32> to vector<8x8xf32>
    %cst_21 = arith.constant dense<0.000000e+00> : vector<8x8xf32>
    %57 = tpu.matmul %54, %55, %cst_21 {dimension_numbers = #tpu.dot_dimension_numbers<[1], [1], [0], [0], [0, 0, 1, 0], [], []>} : vector<8x8xf32>, vector<8x8xf32>, vector<8x8xf32> -> vector<8x8xf32>
    %cst_22 = arith.constant dense<0xFF800000> : vector<8xf32>
    %58 = vector.multi_reduction <maximumf>, %57, %cst_22 [1] : vector<8x8xf32> to vector<8xf32>
    %59 = vector.shape_cast %58 : vector<8xf32> to vector<8x1xf32>
    %60 = vector.broadcast %59 : vector<8x1xf32> to vector<8x8xf32>
    %61 = arith.subf %57, %60 : vector<8x8xf32>
    %62 = math.exp %61 : vector<8x8xf32>
    %cst_23 = arith.constant dense<0.000000e+00> : vector<8xf32>
    %63 = vector.multi_reduction <add>, %62, %cst_23 [1] : vector<8x8xf32> to vector<8xf32>
    %64 = vector.shape_cast %63 : vector<8xf32> to vector<8x1xf32>
    %65 = tpu.reciprocal %64 {approx = true} : vector<8x1xf32> -> vector<8x1xf32>
    %66 = vector.broadcast %65 : vector<8x1xf32> to vector<8x8xf32>
    %67 = arith.mulf %62, %66 : vector<8x8xf32>
    %cst_24 = arith.constant dense<0.000000e+00> : vector<8x8xf32>
    %68 = tpu.matmul %67, %56, %cst_24 {dimension_numbers = #tpu.dot_dimension_numbers<[1], [0], [0], [1], [0, 0, 1, 1], [], []>} : vector<8x8xf32>, vector<8x8xf32>, vector<8x8xf32> -> vector<8x8xf32>
    %c0_25 = arith.constant 0 : index
    %c24 = arith.constant 24 : index
    %69 = vector.load %arg33[%c0_25, %c24] : memref<16x32xf32, #tpu.memory_space<vmem>>, vector<8x8xf32>
    tpu.vector_store %arg33[%c0_25, %c24], %68 {strides = array<i32>} : memref<16x32xf32, #tpu.memory_space<vmem>>, vector<8x8xf32>,
    %70 = vector.extract_strided_slice %5 {offsets = [8, 0], sizes = [8, 8], strides = [1, 1]} : vector<16x96xf32> to vector<8x8xf32>
    %71 = vector.extract_strided_slice %5 {offsets = [8, 32], sizes = [8, 8], strides = [1, 1]} : vector<16x96xf32> to vector<8x8xf32>
    %72 = vector.extract_strided_slice %5 {offsets = [8, 64], sizes = [8, 8], strides = [1, 1]} : vector<16x96xf32> to vector<8x8xf32>
    %cst_26 = arith.constant dense<0.000000e+00> : vector<8x8xf32>
    %73 = tpu.matmul %70, %71, %cst_26 {dimension_numbers = #tpu.dot_dimension_numbers<[1], [1], [0], [0], [0, 0, 1, 0], [], []>} : vector<8x8xf32>, vector<8x8xf32>, vector<8x8xf32> -> vector<8x8xf32>
    %cst_27 = arith.constant dense<0xFF800000> : vector<8xf32>
    %74 = vector.multi_reduction <maximumf>, %73, %cst_27 [1] : vector<8x8xf32> to vector<8xf32>
    %75 = vector.shape_cast %74 : vector<8xf32> to vector<8x1xf32>
    %76 = vector.broadcast %75 : vector<8x1xf32> to vector<8x8xf32>
    %77 = arith.subf %73, %76 : vector<8x8xf32>
    %78 = math.exp %77 : vector<8x8xf32>
    %cst_28 = arith.constant dense<0.000000e+00> : vector<8xf32>
    %79 = vector.multi_reduction <add>, %78, %cst_28 [1] : vector<8x8xf32> to vector<8xf32>
    %80 = vector.shape_cast %79 : vector<8xf32> to vector<8x1xf32>
    %81 = tpu.reciprocal %80 {approx = true} : vector<8x1xf32> -> vector<8x1xf32>
    %82 = vector.broadcast %81 : vector<8x1xf32> to vector<8x8xf32>
    %83 = arith.mulf %78, %82 : vector<8x8xf32>
    %cst_29 = arith.constant dense<0.000000e+00> : vector<8x8xf32>
    %84 = tpu.matmul %83, %72, %cst_29 {dimension_numbers = #tpu.dot_dimension_numbers<[1], [0], [0], [1], [0, 0, 1, 1], [], []>} : vector<8x8xf32>, vector<8x8xf32>, vector<8x8xf32> -> vector<8x8xf32>
    %c8_30 = arith.constant 8 : index
    %c0_31 = arith.constant 0 : index
    %85 = vector.load %arg33[%c8_30, %c0_31] : memref<16x32xf32, #tpu.memory_space<vmem>>, vector<8x8xf32>
    tpu.vector_store %arg33[%c8_30, %c0_31], %84 {strides = array<i32>} : memref<16x32xf32, #tpu.memory_space<vmem>>, vector<8x8xf32>,
    %86 = vector.extract_strided_slice %5 {offsets = [8, 8], sizes = [8, 8], strides = [1, 1]} : vector<16x96xf32> to vector<8x8xf32>
    %87 = vector.extract_strided_slice %5 {offsets = [8, 40], sizes = [8, 8], strides = [1, 1]} : vector<16x96xf32> to vector<8x8xf32>
    %88 = vector.extract_strided_slice %5 {offsets = [8, 72], sizes = [8, 8], strides = [1, 1]} : vector<16x96xf32> to vector<8x8xf32>
    %cst_32 = arith.constant dense<0.000000e+00> : vector<8x8xf32>
    %89 = tpu.matmul %86, %87, %cst_32 {dimension_numbers = #tpu.dot_dimension_numbers<[1], [1], [0], [0], [0, 0, 1, 0], [], []>} : vector<8x8xf32>, vector<8x8xf32>, vector<8x8xf32> -> vector<8x8xf32>
    %cst_33 = arith.constant dense<0xFF800000> : vector<8xf32>
    %90 = vector.multi_reduction <maximumf>, %89, %cst_33 [1] : vector<8x8xf32> to vector<8xf32>
    %91 = vector.shape_cast %90 : vector<8xf32> to vector<8x1xf32>
    %92 = vector.broadcast %91 : vector<8x1xf32> to vector<8x8xf32>
    %93 = arith.subf %89, %92 : vector<8x8xf32>
    %94 = math.exp %93 : vector<8x8xf32>
    %cst_34 = arith.constant dense<0.000000e+00> : vector<8xf32>
    %95 = vector.multi_reduction <add>, %94, %cst_34 [1] : vector<8x8xf32> to vector<8xf32>
    %96 = vector.shape_cast %95 : vector<8xf32> to vector<8x1xf32>
    %97 = tpu.reciprocal %96 {approx = true} : vector<8x1xf32> -> vector<8x1xf32>
    %98 = vector.broadcast %97 : vector<8x1xf32> to vector<8x8xf32>
    %99 = arith.mulf %94, %98 : vector<8x8xf32>
    %cst_35 = arith.constant dense<0.000000e+00> : vector<8x8xf32>
    %100 = tpu.matmul %99, %88, %cst_35 {dimension_numbers = #tpu.dot_dimension_numbers<[1], [0], [0], [1], [0, 0, 1, 1], [], []>} : vector<8x8xf32>, vector<8x8xf32>, vector<8x8xf32> -> vector<8x8xf32>
    %c8_36 = arith.constant 8 : index
    %c8_37 = arith.constant 8 : index
    %101 = vector.load %arg33[%c8_36, %c8_37] : memref<16x32xf32, #tpu.memory_space<vmem>>, vector<8x8xf32>
    tpu.vector_store %arg33[%c8_36, %c8_37], %100 {strides = array<i32>} : memref<16x32xf32, #tpu.memory_space<vmem>>, vector<8x8xf32>,
    %102 = vector.extract_strided_slice %5 {offsets = [8, 16], sizes = [8, 8], strides = [1, 1]} : vector<16x96xf32> to vector<8x8xf32>
    %103 = vector.extract_strided_slice %5 {offsets = [8, 48], sizes = [8, 8], strides = [1, 1]} : vector<16x96xf32> to vector<8x8xf32>
    %104 = vector.extract_strided_slice %5 {offsets = [8, 80], sizes = [8, 8], strides = [1, 1]} : vector<16x96xf32> to vector<8x8xf32>
    %cst_38 = arith.constant dense<0.000000e+00> : vector<8x8xf32>
    %105 = tpu.matmul %102, %103, %cst_38 {dimension_numbers = #tpu.dot_dimension_numbers<[1], [1], [0], [0], [0, 0, 1, 0], [], []>} : vector<8x8xf32>, vector<8x8xf32>, vector<8x8xf32> -> vector<8x8xf32>
    %cst_39 = arith.constant dense<0xFF800000> : vector<8xf32>
    %106 = vector.multi_reduction <maximumf>, %105, %cst_39 [1] : vector<8x8xf32> to vector<8xf32>
    %107 = vector.shape_cast %106 : vector<8xf32> to vector<8x1xf32>
    %108 = vector.broadcast %107 : vector<8x1xf32> to vector<8x8xf32>
    %109 = arith.subf %105, %108 : vector<8x8xf32>
    %110 = math.exp %109 : vector<8x8xf32>
    %cst_40 = arith.constant dense<0.000000e+00> : vector<8xf32>
    %111 = vector.multi_reduction <add>, %110, %cst_40 [1] : vector<8x8xf32> to vector<8xf32>
    %112 = vector.shape_cast %111 : vector<8xf32> to vector<8x1xf32>
    %113 = tpu.reciprocal %112 {approx = true} : vector<8x1xf32> -> vector<8x1xf32>
    %114 = vector.broadcast %113 : vector<8x1xf32> to vector<8x8xf32>
    %115 = arith.mulf %110, %114 : vector<8x8xf32>
    %cst_41 = arith.constant dense<0.000000e+00> : vector<8x8xf32>
    %116 = tpu.matmul %115, %104, %cst_41 {dimension_numbers = #tpu.dot_dimension_numbers<[1], [0], [0], [1], [0, 0, 1, 1], [], []>} : vector<8x8xf32>, vector<8x8xf32>, vector<8x8xf32> -> vector<8x8xf32>
    %c8_42 = arith.constant 8 : index
    %c16_43 = arith.constant 16 : index
    %117 = vector.load %arg33[%c8_42, %c16_43] : memref<16x32xf32, #tpu.memory_space<vmem>>, vector<8x8xf32>
    tpu.vector_store %arg33[%c8_42, %c16_43], %116 {strides = array<i32>} : memref<16x32xf32, #tpu.memory_space<vmem>>, vector<8x8xf32>,
    %118 = vector.extract_strided_slice %5 {offsets = [8, 24], sizes = [8, 8], strides = [1, 1]} : vector<16x96xf32> to vector<8x8xf32>
    %119 = vector.extract_strided_slice %5 {offsets = [8, 56], sizes = [8, 8], strides = [1, 1]} : vector<16x96xf32> to vector<8x8xf32>
    %120 = vector.extract_strided_slice %5 {offsets = [8, 88], sizes = [8, 8], strides = [1, 1]} : vector<16x96xf32> to vector<8x8xf32>
    %cst_44 = arith.constant dense<0.000000e+00> : vector<8x8xf32>
    %121 = tpu.matmul %118, %119, %cst_44 {dimension_numbers = #tpu.dot_dimension_numbers<[1], [1], [0], [0], [0, 0, 1, 0], [], []>} : vector<8x8xf32>, vector<8x8xf32>, vector<8x8xf32> -> vector<8x8xf32>
    %cst_45 = arith.constant dense<0xFF800000> : vector<8xf32>
    %122 = vector.multi_reduction <maximumf>, %121, %cst_45 [1] : vector<8x8xf32> to vector<8xf32>
    %123 = vector.shape_cast %122 : vector<8xf32> to vector<8x1xf32>
    %124 = vector.broadcast %123 : vector<8x1xf32> to vector<8x8xf32>
    %125 = arith.subf %121, %124 : vector<8x8xf32>
    %126 = math.exp %125 : vector<8x8xf32>
    %cst_46 = arith.constant dense<0.000000e+00> : vector<8xf32>
    %127 = vector.multi_reduction <add>, %126, %cst_46 [1] : vector<8x8xf32> to vector<8xf32>
    %128 = vector.shape_cast %127 : vector<8xf32> to vector<8x1xf32>
    %129 = tpu.reciprocal %128 {approx = true} : vector<8x1xf32> -> vector<8x1xf32>
    %130 = vector.broadcast %129 : vector<8x1xf32> to vector<8x8xf32>
    %131 = arith.mulf %126, %130 : vector<8x8xf32>
    %cst_47 = arith.constant dense<0.000000e+00> : vector<8x8xf32>
    %132 = tpu.matmul %131, %120, %cst_47 {dimension_numbers = #tpu.dot_dimension_numbers<[1], [0], [0], [1], [0, 0, 1, 1], [], []>} : vector<8x8xf32>, vector<8x8xf32>, vector<8x8xf32> -> vector<8x8xf32>
    %c8_48 = arith.constant 8 : index
    %c24_49 = arith.constant 24 : index
    %133 = vector.load %arg33[%c8_48, %c24_49] : memref<16x32xf32, #tpu.memory_space<vmem>>, vector<8x8xf32>
    tpu.vector_store %arg33[%c8_48, %c24_49], %132 {strides = array<i32>} : memref<16x32xf32, #tpu.memory_space<vmem>>, vector<8x8xf32>,
    %c0_50 = arith.constant 0 : index
    %c0_51 = arith.constant 0 : index
    %134 = vector.load %arg33[%c0_50, %c0_51] : memref<16x32xf32, #tpu.memory_space<vmem>>, vector<16x32xf32>
    %c0_52 = arith.constant 0 : index
    %c0_53 = arith.constant 0 : index
    %135 = vector.load %arg4[%c0_52, %c0_53] : memref<32x32xf32, #tpu.memory_space<vmem>>, vector<32x32xf32>
    %cst_54 = arith.constant dense<0.000000e+00> : vector<16x32xf32>
    %136 = tpu.matmul %134, %135, %cst_54 {dimension_numbers = #tpu.dot_dimension_numbers<[1], [0], [0], [1], [0, 0, 1, 1], [], []>} : vector<16x32xf32>, vector<32x32xf32>, vector<16x32xf32> -> vector<16x32xf32>
    %c0_55 = arith.constant 0 : index
    %c0_56 = arith.constant 0 : index
    %137 = vector.load %arg5[%c0_55, %c0_56] : memref<1x32xf32, #tpu.memory_space<vmem>>, vector<1x32xf32>
    %138 = vector.broadcast %137 : vector<1x32xf32> to vector<16x32xf32>
    %139 = arith.addf %136, %138 : vector<16x32xf32>
    %140 = arith.addf %0, %139 : vector<16x32xf32>
    %cst_57 = arith.constant dense<0.000000e+00> : vector<16xf32>
    %141 = vector.multi_reduction <add>, %140, %cst_57 [1] : vector<16x32xf32> to vector<16xf32>
    %142 = vector.shape_cast %141 : vector<16xf32> to vector<16x1xf32>
    %cst_58 = arith.constant 3.200000e+01 : f32
    %143 = vector.broadcast %cst_58 : f32 to vector<16x1xf32>
    %144 = arith.divf %142, %143 : vector<16x1xf32>
    %145 = vector.broadcast %144 : vector<16x1xf32> to vector<16x32xf32>
    %146 = arith.subf %140, %145 : vector<16x32xf32>
    %147 = arith.mulf %146, %146 : vector<16x32xf32>
    %cst_59 = arith.constant dense<0.000000e+00> : vector<16xf32>
    %148 = vector.multi_reduction <add>, %147, %cst_59 [1] : vector<16x32xf32> to vector<16xf32>
    %149 = vector.shape_cast %148 : vector<16xf32> to vector<16x1xf32>
    %cst_60 = arith.constant 3.200000e+01 : f32
    %150 = vector.broadcast %cst_60 : f32 to vector<16x1xf32>
    %151 = arith.divf %149, %150 : vector<16x1xf32>
    %152 = vector.broadcast %144 : vector<16x1xf32> to vector<16x32xf32>
    %153 = arith.subf %140, %152 : vector<16x32xf32>
    %cst_61 = arith.constant 9.99999974E-6 : f32
    %154 = vector.broadcast %cst_61 : f32 to vector<16x1xf32>
    %155 = arith.addf %151, %154 : vector<16x1xf32>
    %156 = math.rsqrt %155 : vector<16x1xf32>
    %157 = vector.broadcast %156 : vector<16x1xf32> to vector<16x32xf32>
    %158 = arith.mulf %153, %157 : vector<16x32xf32>
    %c0_62 = arith.constant 0 : index
    %c0_63 = arith.constant 0 : index
    %159 = vector.load %arg6[%c0_62, %c0_63] : memref<1x32xf32, #tpu.memory_space<vmem>>, vector<1x32xf32>
    %160 = vector.broadcast %159 : vector<1x32xf32> to vector<16x32xf32>
    %161 = arith.mulf %158, %160 : vector<16x32xf32>
    %c0_64 = arith.constant 0 : index
    %c0_65 = arith.constant 0 : index
    %162 = vector.load %arg7[%c0_64, %c0_65] : memref<1x32xf32, #tpu.memory_space<vmem>>, vector<1x32xf32>
    %163 = vector.broadcast %162 : vector<1x32xf32> to vector<16x32xf32>
    %164 = arith.addf %161, %163 : vector<16x32xf32>
    %c0_66 = arith.constant 0 : index
    %c0_67 = arith.constant 0 : index
    %165 = vector.load %arg8[%c0_66, %c0_67] : memref<32x64xf32, #tpu.memory_space<vmem>>, vector<32x64xf32>
    %cst_68 = arith.constant dense<0.000000e+00> : vector<16x64xf32>
    %166 = tpu.matmul %164, %165, %cst_68 {dimension_numbers = #tpu.dot_dimension_numbers<[1], [0], [0], [1], [0, 0, 1, 1], [], []>} : vector<16x32xf32>, vector<32x64xf32>, vector<16x64xf32> -> vector<16x64xf32>
    %c0_69 = arith.constant 0 : index
    %c0_70 = arith.constant 0 : index
    %167 = vector.load %arg9[%c0_69, %c0_70] : memref<1x64xf32, #tpu.memory_space<vmem>>, vector<1x64xf32>
    %168 = vector.broadcast %167 : vector<1x64xf32> to vector<16x64xf32>
    %169 = arith.addf %166, %168 : vector<16x64xf32>
    %cst_71 = arith.constant 0.000000e+00 : f32
    %170 = vector.broadcast %cst_71 : f32 to vector<16x64xf32>
    %171 = arith.maximumf %169, %170 : vector<16x64xf32>
    %c0_72 = arith.constant 0 : index
    %c0_73 = arith.constant 0 : index
    %172 = vector.load %arg10[%c0_72, %c0_73] : memref<64x32xf32, #tpu.memory_space<vmem>>, vector<64x32xf32>
    %cst_74 = arith.constant dense<0.000000e+00> : vector<16x32xf32>
    %173 = tpu.matmul %171, %172, %cst_74 {dimension_numbers = #tpu.dot_dimension_numbers<[1], [0], [0], [1], [0, 0, 1, 1], [], []>} : vector<16x64xf32>, vector<64x32xf32>, vector<16x32xf32> -> vector<16x32xf32>
    %c0_75 = arith.constant 0 : index
    %c0_76 = arith.constant 0 : index
    %174 = vector.load %arg11[%c0_75, %c0_76] : memref<1x32xf32, #tpu.memory_space<vmem>>, vector<1x32xf32>
    %175 = vector.broadcast %174 : vector<1x32xf32> to vector<16x32xf32>
    %176 = arith.addf %173, %175 : vector<16x32xf32>
    %177 = arith.addf %164, %176 : vector<16x32xf32>
    %cst_77 = arith.constant dense<0.000000e+00> : vector<16xf32>
    %178 = vector.multi_reduction <add>, %177, %cst_77 [1] : vector<16x32xf32> to vector<16xf32>
    %179 = vector.shape_cast %178 : vector<16xf32> to vector<16x1xf32>
    %cst_78 = arith.constant 3.200000e+01 : f32
    %180 = vector.broadcast %cst_78 : f32 to vector<16x1xf32>
    %181 = arith.divf %179, %180 : vector<16x1xf32>
    %182 = vector.broadcast %181 : vector<16x1xf32> to vector<16x32xf32>
    %183 = arith.subf %177, %182 : vector<16x32xf32>
    %184 = arith.mulf %183, %183 : vector<16x32xf32>
    %cst_79 = arith.constant dense<0.000000e+00> : vector<16xf32>
    %185 = vector.multi_reduction <add>, %184, %cst_79 [1] : vector<16x32xf32> to vector<16xf32>
    %186 = vector.shape_cast %185 : vector<16xf32> to vector<16x1xf32>
    %cst_80 = arith.constant 3.200000e+01 : f32
    %187 = vector.broadcast %cst_80 : f32 to vector<16x1xf32>
    %188 = arith.divf %186, %187 : vector<16x1xf32>
    %189 = vector.broadcast %181 : vector<16x1xf32> to vector<16x32xf32>
    %190 = arith.subf %177, %189 : vector<16x32xf32>
    %cst_81 = arith.constant 9.99999974E-6 : f32
    %191 = vector.broadcast %cst_81 : f32 to vector<16x1xf32>
    %192 = arith.addf %188, %191 : vector<16x1xf32>
    %193 = math.rsqrt %192 : vector<16x1xf32>
    %194 = vector.broadcast %193 : vector<16x1xf32> to vector<16x32xf32>
    %195 = arith.mulf %190, %194 : vector<16x32xf32>
    %c0_82 = arith.constant 0 : index
    %c0_83 = arith.constant 0 : index
    %196 = vector.load %arg12[%c0_82, %c0_83] : memref<1x32xf32, #tpu.memory_space<vmem>>, vector<1x32xf32>
    %197 = vector.broadcast %196 : vector<1x32xf32> to vector<16x32xf32>
    %198 = arith.mulf %195, %197 : vector<16x32xf32>
    %c0_84 = arith.constant 0 : index
    %c0_85 = arith.constant 0 : index
    %199 = vector.load %arg13[%c0_84, %c0_85] : memref<1x32xf32, #tpu.memory_space<vmem>>, vector<1x32xf32>
    %200 = vector.broadcast %199 : vector<1x32xf32> to vector<16x32xf32>
    %201 = arith.addf %198, %200 : vector<16x32xf32>
    %c0_86 = arith.constant 0 : index
    %c0_87 = arith.constant 0 : index
    %202 = vector.load %arg14[%c0_86, %c0_87] : memref<32x96xf32, #tpu.memory_space<vmem>>, vector<32x96xf32>
    %cst_88 = arith.constant dense<0.000000e+00> : vector<16x96xf32>
    %203 = tpu.matmul %201, %202, %cst_88 {dimension_numbers = #tpu.dot_dimension_numbers<[1], [0], [0], [1], [0, 0, 1, 1], [], []>} : vector<16x32xf32>, vector<32x96xf32>, vector<16x96xf32> -> vector<16x96xf32>
    %c0_89 = arith.constant 0 : index
    %c0_90 = arith.constant 0 : index
    %204 = vector.load %arg15[%c0_89, %c0_90] : memref<1x96xf32, #tpu.memory_space<vmem>>, vector<1x96xf32>
    %205 = vector.broadcast %204 : vector<1x96xf32> to vector<16x96xf32>
    %206 = arith.addf %203, %205 : vector<16x96xf32>
    %207 = vector.extract_strided_slice %206 {offsets = [0, 0], sizes = [8, 8], strides = [1, 1]} : vector<16x96xf32> to vector<8x8xf32>
    %208 = vector.extract_strided_slice %206 {offsets = [0, 32], sizes = [8, 8], strides = [1, 1]} : vector<16x96xf32> to vector<8x8xf32>
    %209 = vector.extract_strided_slice %206 {offsets = [0, 64], sizes = [8, 8], strides = [1, 1]} : vector<16x96xf32> to vector<8x8xf32>
    %cst_91 = arith.constant dense<0.000000e+00> : vector<8x8xf32>
    %210 = tpu.matmul %207, %208, %cst_91 {dimension_numbers = #tpu.dot_dimension_numbers<[1], [1], [0], [0], [0, 0, 1, 0], [], []>} : vector<8x8xf32>, vector<8x8xf32>, vector<8x8xf32> -> vector<8x8xf32>
    %cst_92 = arith.constant dense<0xFF800000> : vector<8xf32>
    %211 = vector.multi_reduction <maximumf>, %210, %cst_92 [1] : vector<8x8xf32> to vector<8xf32>
    %212 = vector.shape_cast %211 : vector<8xf32> to vector<8x1xf32>
    %213 = vector.broadcast %212 : vector<8x1xf32> to vector<8x8xf32>
    %214 = arith.subf %210, %213 : vector<8x8xf32>
    %215 = math.exp %214 : vector<8x8xf32>
    %cst_93 = arith.constant dense<0.000000e+00> : vector<8xf32>
    %216 = vector.multi_reduction <add>, %215, %cst_93 [1] : vector<8x8xf32> to vector<8xf32>
    %217 = vector.shape_cast %216 : vector<8xf32> to vector<8x1xf32>
    %218 = tpu.reciprocal %217 {approx = true} : vector<8x1xf32> -> vector<8x1xf32>
    %219 = vector.broadcast %218 : vector<8x1xf32> to vector<8x8xf32>
    %220 = arith.mulf %215, %219 : vector<8x8xf32>
    %cst_94 = arith.constant dense<0.000000e+00> : vector<8x8xf32>
    %221 = tpu.matmul %220, %209, %cst_94 {dimension_numbers = #tpu.dot_dimension_numbers<[1], [0], [0], [1], [0, 0, 1, 1], [], []>} : vector<8x8xf32>, vector<8x8xf32>, vector<8x8xf32> -> vector<8x8xf32>
    %c0_95 = arith.constant 0 : index
    %c0_96 = arith.constant 0 : index
    %222 = vector.load %arg33[%c0_95, %c0_96] : memref<16x32xf32, #tpu.memory_space<vmem>>, vector<8x8xf32>
    tpu.vector_store %arg33[%c0_95, %c0_96], %221 {strides = array<i32>} : memref<16x32xf32, #tpu.memory_space<vmem>>, vector<8x8xf32>,
    %223 = vector.extract_strided_slice %206 {offsets = [0, 8], sizes = [8, 8], strides = [1, 1]} : vector<16x96xf32> to vector<8x8xf32>
    %224 = vector.extract_strided_slice %206 {offsets = [0, 40], sizes = [8, 8], strides = [1, 1]} : vector<16x96xf32> to vector<8x8xf32>
    %225 = vector.extract_strided_slice %206 {offsets = [0, 72], sizes = [8, 8], strides = [1, 1]} : vector<16x96xf32> to vector<8x8xf32>
    %cst_97 = arith.constant dense<0.000000e+00> : vector<8x8xf32>
    %226 = tpu.matmul %223, %224, %cst_97 {dimension_numbers = #tpu.dot_dimension_numbers<[1], [1], [0], [0], [0, 0, 1, 0], [], []>} : vector<8x8xf32>, vector<8x8xf32>, vector<8x8xf32> -> vector<8x8xf32>
    %cst_98 = arith.constant dense<0xFF800000> : vector<8xf32>
    %227 = vector.multi_reduction <maximumf>, %226, %cst_98 [1] : vector<8x8xf32> to vector<8xf32>
    %228 = vector.shape_cast %227 : vector<8xf32> to vector<8x1xf32>
    %229 = vector.broadcast %228 : vector<8x1xf32> to vector<8x8xf32>
    %230 = arith.subf %226, %229 : vector<8x8xf32>
    %231 = math.exp %230 : vector<8x8xf32>
    %cst_99 = arith.constant dense<0.000000e+00> : vector<8xf32>
    %232 = vector.multi_reduction <add>, %231, %cst_99 [1] : vector<8x8xf32> to vector<8xf32>
    %233 = vector.shape_cast %232 : vector<8xf32> to vector<8x1xf32>
    %234 = tpu.reciprocal %233 {approx = true} : vector<8x1xf32> -> vector<8x1xf32>
    %235 = vector.broadcast %234 : vector<8x1xf32> to vector<8x8xf32>
    %236 = arith.mulf %231, %235 : vector<8x8xf32>
    %cst_100 = arith.constant dense<0.000000e+00> : vector<8x8xf32>
    %237 = tpu.matmul %236, %225, %cst_100 {dimension_numbers = #tpu.dot_dimension_numbers<[1], [0], [0], [1], [0, 0, 1, 1], [], []>} : vector<8x8xf32>, vector<8x8xf32>, vector<8x8xf32> -> vector<8x8xf32>
    %c0_101 = arith.constant 0 : index
    %c8_102 = arith.constant 8 : index
    %238 = vector.load %arg33[%c0_101, %c8_102] : memref<16x32xf32, #tpu.memory_space<vmem>>, vector<8x8xf32>
    tpu.vector_store %arg33[%c0_101, %c8_102], %237 {strides = array<i32>} : memref<16x32xf32, #tpu.memory_space<vmem>>, vector<8x8xf32>,
    %239 = vector.extract_strided_slice %206 {offsets = [0, 16], sizes = [8, 8], strides = [1, 1]} : vector<16x96xf32> to vector<8x8xf32>
    %240 = vector.extract_strided_slice %206 {offsets = [0, 48], sizes = [8, 8], strides = [1, 1]} : vector<16x96xf32> to vector<8x8xf32>
    %241 = vector.extract_strided_slice %206 {offsets = [0, 80], sizes = [8, 8], strides = [1, 1]} : vector<16x96xf32> to vector<8x8xf32>
    %cst_103 = arith.constant dense<0.000000e+00> : vector<8x8xf32>
    %242 = tpu.matmul %239, %240, %cst_103 {dimension_numbers = #tpu.dot_dimension_numbers<[1], [1], [0], [0], [0, 0, 1, 0], [], []>} : vector<8x8xf32>, vector<8x8xf32>, vector<8x8xf32> -> vector<8x8xf32>
    %cst_104 = arith.constant dense<0xFF800000> : vector<8xf32>
    %243 = vector.multi_reduction <maximumf>, %242, %cst_104 [1] : vector<8x8xf32> to vector<8xf32>
    %244 = vector.shape_cast %243 : vector<8xf32> to vector<8x1xf32>
    %245 = vector.broadcast %244 : vector<8x1xf32> to vector<8x8xf32>
    %246 = arith.subf %242, %245 : vector<8x8xf32>
    %247 = math.exp %246 : vector<8x8xf32>
    %cst_105 = arith.constant dense<0.000000e+00> : vector<8xf32>
    %248 = vector.multi_reduction <add>, %247, %cst_105 [1] : vector<8x8xf32> to vector<8xf32>
    %249 = vector.shape_cast %248 : vector<8xf32> to vector<8x1xf32>
    %250 = tpu.reciprocal %249 {approx = true} : vector<8x1xf32> -> vector<8x1xf32>
    %251 = vector.broadcast %250 : vector<8x1xf32> to vector<8x8xf32>
    %252 = arith.mulf %247, %251 : vector<8x8xf32>
    %cst_106 = arith.constant dense<0.000000e+00> : vector<8x8xf32>
    %253 = tpu.matmul %252, %241, %cst_106 {dimension_numbers = #tpu.dot_dimension_numbers<[1], [0], [0], [1], [0, 0, 1, 1], [], []>} : vector<8x8xf32>, vector<8x8xf32>, vector<8x8xf32> -> vector<8x8xf32>
    %c0_107 = arith.constant 0 : index
    %c16_108 = arith.constant 16 : index
    %254 = vector.load %arg33[%c0_107, %c16_108] : memref<16x32xf32, #tpu.memory_space<vmem>>, vector<8x8xf32>
    tpu.vector_store %arg33[%c0_107, %c16_108], %253 {strides = array<i32>} : memref<16x32xf32, #tpu.memory_space<vmem>>, vector<8x8xf32>,
    %255 = vector.extract_strided_slice %206 {offsets = [0, 24], sizes = [8, 8], strides = [1, 1]} : vector<16x96xf32> to vector<8x8xf32>
    %256 = vector.extract_strided_slice %206 {offsets = [0, 56], sizes = [8, 8], strides = [1, 1]} : vector<16x96xf32> to vector<8x8xf32>
    %257 = vector.extract_strided_slice %206 {offsets = [0, 88], sizes = [8, 8], strides = [1, 1]} : vector<16x96xf32> to vector<8x8xf32>
    %cst_109 = arith.constant dense<0.000000e+00> : vector<8x8xf32>
    %258 = tpu.matmul %255, %256, %cst_109 {dimension_numbers = #tpu.dot_dimension_numbers<[1], [1], [0], [0], [0, 0, 1, 0], [], []>} : vector<8x8xf32>, vector<8x8xf32>, vector<8x8xf32> -> vector<8x8xf32>
    %cst_110 = arith.constant dense<0xFF800000> : vector<8xf32>
    %259 = vector.multi_reduction <maximumf>, %258, %cst_110 [1] : vector<8x8xf32> to vector<8xf32>
    %260 = vector.shape_cast %259 : vector<8xf32> to vector<8x1xf32>
    %261 = vector.broadcast %260 : vector<8x1xf32> to vector<8x8xf32>
    %262 = arith.subf %258, %261 : vector<8x8xf32>
    %263 = math.exp %262 : vector<8x8xf32>
    %cst_111 = arith.constant dense<0.000000e+00> : vector<8xf32>
    %264 = vector.multi_reduction <add>, %263, %cst_111 [1] : vector<8x8xf32> to vector<8xf32>
    %265 = vector.shape_cast %264 : vector<8xf32> to vector<8x1xf32>
    %266 = tpu.reciprocal %265 {approx = true} : vector<8x1xf32> -> vector<8x1xf32>
    %267 = vector.broadcast %266 : vector<8x1xf32> to vector<8x8xf32>
    %268 = arith.mulf %263, %267 : vector<8x8xf32>
    %cst_112 = arith.constant dense<0.000000e+00> : vector<8x8xf32>
    %269 = tpu.matmul %268, %257, %cst_112 {dimension_numbers = #tpu.dot_dimension_numbers<[1], [0], [0], [1], [0, 0, 1, 1], [], []>} : vector<8x8xf32>, vector<8x8xf32>, vector<8x8xf32> -> vector<8x8xf32>
    %c0_113 = arith.constant 0 : index
    %c24_114 = arith.constant 24 : index
    %270 = vector.load %arg33[%c0_113, %c24_114] : memref<16x32xf32, #tpu.memory_space<vmem>>, vector<8x8xf32>
    tpu.vector_store %arg33[%c0_113, %c24_114], %269 {strides = array<i32>} : memref<16x32xf32, #tpu.memory_space<vmem>>, vector<8x8xf32>,
    %271 = vector.extract_strided_slice %206 {offsets = [8, 0], sizes = [8, 8], strides = [1, 1]} : vector<16x96xf32> to vector<8x8xf32>
    %272 = vector.extract_strided_slice %206 {offsets = [8, 32], sizes = [8, 8], strides = [1, 1]} : vector<16x96xf32> to vector<8x8xf32>
    %273 = vector.extract_strided_slice %206 {offsets = [8, 64], sizes = [8, 8], strides = [1, 1]} : vector<16x96xf32> to vector<8x8xf32>
    %cst_115 = arith.constant dense<0.000000e+00> : vector<8x8xf32>
    %274 = tpu.matmul %271, %272, %cst_115 {dimension_numbers = #tpu.dot_dimension_numbers<[1], [1], [0], [0], [0, 0, 1, 0], [], []>} : vector<8x8xf32>, vector<8x8xf32>, vector<8x8xf32> -> vector<8x8xf32>
    %cst_116 = arith.constant dense<0xFF800000> : vector<8xf32>
    %275 = vector.multi_reduction <maximumf>, %274, %cst_116 [1] : vector<8x8xf32> to vector<8xf32>
    %276 = vector.shape_cast %275 : vector<8xf32> to vector<8x1xf32>
    %277 = vector.broadcast %276 : vector<8x1xf32> to vector<8x8xf32>
    %278 = arith.subf %274, %277 : vector<8x8xf32>
    %279 = math.exp %278 : vector<8x8xf32>
    %cst_117 = arith.constant dense<0.000000e+00> : vector<8xf32>
    %280 = vector.multi_reduction <add>, %279, %cst_117 [1] : vector<8x8xf32> to vector<8xf32>
    %281 = vector.shape_cast %280 : vector<8xf32> to vector<8x1xf32>
    %282 = tpu.reciprocal %281 {approx = true} : vector<8x1xf32> -> vector<8x1xf32>
    %283 = vector.broadcast %282 : vector<8x1xf32> to vector<8x8xf32>
    %284 = arith.mulf %279, %283 : vector<8x8xf32>
    %cst_118 = arith.constant dense<0.000000e+00> : vector<8x8xf32>
    %285 = tpu.matmul %284, %273, %cst_118 {dimension_numbers = #tpu.dot_dimension_numbers<[1], [0], [0], [1], [0, 0, 1, 1], [], []>} : vector<8x8xf32>, vector<8x8xf32>, vector<8x8xf32> -> vector<8x8xf32>
    %c8_119 = arith.constant 8 : index
    %c0_120 = arith.constant 0 : index
    %286 = vector.load %arg33[%c8_119, %c0_120] : memref<16x32xf32, #tpu.memory_space<vmem>>, vector<8x8xf32>
    tpu.vector_store %arg33[%c8_119, %c0_120], %285 {strides = array<i32>} : memref<16x32xf32, #tpu.memory_space<vmem>>, vector<8x8xf32>,
    %287 = vector.extract_strided_slice %206 {offsets = [8, 8], sizes = [8, 8], strides = [1, 1]} : vector<16x96xf32> to vector<8x8xf32>
    %288 = vector.extract_strided_slice %206 {offsets = [8, 40], sizes = [8, 8], strides = [1, 1]} : vector<16x96xf32> to vector<8x8xf32>
    %289 = vector.extract_strided_slice %206 {offsets = [8, 72], sizes = [8, 8], strides = [1, 1]} : vector<16x96xf32> to vector<8x8xf32>
    %cst_121 = arith.constant dense<0.000000e+00> : vector<8x8xf32>
    %290 = tpu.matmul %287, %288, %cst_121 {dimension_numbers = #tpu.dot_dimension_numbers<[1], [1], [0], [0], [0, 0, 1, 0], [], []>} : vector<8x8xf32>, vector<8x8xf32>, vector<8x8xf32> -> vector<8x8xf32>
    %cst_122 = arith.constant dense<0xFF800000> : vector<8xf32>
    %291 = vector.multi_reduction <maximumf>, %290, %cst_122 [1] : vector<8x8xf32> to vector<8xf32>
    %292 = vector.shape_cast %291 : vector<8xf32> to vector<8x1xf32>
    %293 = vector.broadcast %292 : vector<8x1xf32> to vector<8x8xf32>
    %294 = arith.subf %290, %293 : vector<8x8xf32>
    %295 = math.exp %294 : vector<8x8xf32>
    %cst_123 = arith.constant dense<0.000000e+00> : vector<8xf32>
    %296 = vector.multi_reduction <add>, %295, %cst_123 [1] : vector<8x8xf32> to vector<8xf32>
    %297 = vector.shape_cast %296 : vector<8xf32> to vector<8x1xf32>
    %298 = tpu.reciprocal %297 {approx = true} : vector<8x1xf32> -> vector<8x1xf32>
    %299 = vector.broadcast %298 : vector<8x1xf32> to vector<8x8xf32>
    %300 = arith.mulf %295, %299 : vector<8x8xf32>
    %cst_124 = arith.constant dense<0.000000e+00> : vector<8x8xf32>
    %301 = tpu.matmul %300, %289, %cst_124 {dimension_numbers = #tpu.dot_dimension_numbers<[1], [0], [0], [1], [0, 0, 1, 1], [], []>} : vector<8x8xf32>, vector<8x8xf32>, vector<8x8xf32> -> vector<8x8xf32>
    %c8_125 = arith.constant 8 : index
    %c8_126 = arith.constant 8 : index
    %302 = vector.load %arg33[%c8_125, %c8_126] : memref<16x32xf32, #tpu.memory_space<vmem>>, vector<8x8xf32>
    tpu.vector_store %arg33[%c8_125, %c8_126], %301 {strides = array<i32>} : memref<16x32xf32, #tpu.memory_space<vmem>>, vector<8x8xf32>,
    %303 = vector.extract_strided_slice %206 {offsets = [8, 16], sizes = [8, 8], strides = [1, 1]} : vector<16x96xf32> to vector<8x8xf32>
    %304 = vector.extract_strided_slice %206 {offsets = [8, 48], sizes = [8, 8], strides = [1, 1]} : vector<16x96xf32> to vector<8x8xf32>
    %305 = vector.extract_strided_slice %206 {offsets = [8, 80], sizes = [8, 8], strides = [1, 1]} : vector<16x96xf32> to vector<8x8xf32>
    %cst_127 = arith.constant dense<0.000000e+00> : vector<8x8xf32>
    %306 = tpu.matmul %303, %304, %cst_127 {dimension_numbers = #tpu.dot_dimension_numbers<[1], [1], [0], [0], [0, 0, 1, 0], [], []>} : vector<8x8xf32>, vector<8x8xf32>, vector<8x8xf32> -> vector<8x8xf32>
    %cst_128 = arith.constant dense<0xFF800000> : vector<8xf32>
    %307 = vector.multi_reduction <maximumf>, %306, %cst_128 [1] : vector<8x8xf32> to vector<8xf32>
    %308 = vector.shape_cast %307 : vector<8xf32> to vector<8x1xf32>
    %309 = vector.broadcast %308 : vector<8x1xf32> to vector<8x8xf32>
    %310 = arith.subf %306, %309 : vector<8x8xf32>
    %311 = math.exp %310 : vector<8x8xf32>
    %cst_129 = arith.constant dense<0.000000e+00> : vector<8xf32>
    %312 = vector.multi_reduction <add>, %311, %cst_129 [1] : vector<8x8xf32> to vector<8xf32>
    %313 = vector.shape_cast %312 : vector<8xf32> to vector<8x1xf32>
    %314 = tpu.reciprocal %313 {approx = true} : vector<8x1xf32> -> vector<8x1xf32>
    %315 = vector.broadcast %314 : vector<8x1xf32> to vector<8x8xf32>
    %316 = arith.mulf %311, %315 : vector<8x8xf32>
    %cst_130 = arith.constant dense<0.000000e+00> : vector<8x8xf32>
    %317 = tpu.matmul %316, %305, %cst_130 {dimension_numbers = #tpu.dot_dimension_numbers<[1], [0], [0], [1], [0, 0, 1, 1], [], []>} : vector<8x8xf32>, vector<8x8xf32>, vector<8x8xf32> -> vector<8x8xf32>
    %c8_131 = arith.constant 8 : index
    %c16_132 = arith.constant 16 : index
    %318 = vector.load %arg33[%c8_131, %c16_132] : memref<16x32xf32, #tpu.memory_space<vmem>>, vector<8x8xf32>
    tpu.vector_store %arg33[%c8_131, %c16_132], %317 {strides = array<i32>} : memref<16x32xf32, #tpu.memory_space<vmem>>, vector<8x8xf32>,
    %319 = vector.extract_strided_slice %206 {offsets = [8, 24], sizes = [8, 8], strides = [1, 1]} : vector<16x96xf32> to vector<8x8xf32>
    %320 = vector.extract_strided_slice %206 {offsets = [8, 56], sizes = [8, 8], strides = [1, 1]} : vector<16x96xf32> to vector<8x8xf32>
    %321 = vector.extract_strided_slice %206 {offsets = [8, 88], sizes = [8, 8], strides = [1, 1]} : vector<16x96xf32> to vector<8x8xf32>
    %cst_133 = arith.constant dense<0.000000e+00> : vector<8x8xf32>
    %322 = tpu.matmul %319, %320, %cst_133 {dimension_numbers = #tpu.dot_dimension_numbers<[1], [1], [0], [0], [0, 0, 1, 0], [], []>} : vector<8x8xf32>, vector<8x8xf32>, vector<8x8xf32> -> vector<8x8xf32>
    %cst_134 = arith.constant dense<0xFF800000> : vector<8xf32>
    %323 = vector.multi_reduction <maximumf>, %322, %cst_134 [1] : vector<8x8xf32> to vector<8xf32>
    %324 = vector.shape_cast %323 : vector<8xf32> to vector<8x1xf32>
    %325 = vector.broadcast %324 : vector<8x1xf32> to vector<8x8xf32>
    %326 = arith.subf %322, %325 : vector<8x8xf32>
    %327 = math.exp %326 : vector<8x8xf32>
    %cst_135 = arith.constant dense<0.000000e+00> : vector<8xf32>
    %328 = vector.multi_reduction <add>, %327, %cst_135 [1] : vector<8x8xf32> to vector<8xf32>
    %329 = vector.shape_cast %328 : vector<8xf32> to vector<8x1xf32>
    %330 = tpu.reciprocal %329 {approx = true} : vector<8x1xf32> -> vector<8x1xf32>
    %331 = vector.broadcast %330 : vector<8x1xf32> to vector<8x8xf32>
    %332 = arith.mulf %327, %331 : vector<8x8xf32>
    %cst_136 = arith.constant dense<0.000000e+00> : vector<8x8xf32>
    %333 = tpu.matmul %332, %321, %cst_136 {dimension_numbers = #tpu.dot_dimension_numbers<[1], [0], [0], [1], [0, 0, 1, 1], [], []>} : vector<8x8xf32>, vector<8x8xf32>, vector<8x8xf32> -> vector<8x8xf32>
    %c8_137 = arith.constant 8 : index
    %c24_138 = arith.constant 24 : index
    %334 = vector.load %arg33[%c8_137, %c24_138] : memref<16x32xf32, #tpu.memory_space<vmem>>, vector<8x8xf32>
    tpu.vector_store %arg33[%c8_137, %c24_138], %333 {strides = array<i32>} : memref<16x32xf32, #tpu.memory_space<vmem>>, vector<8x8xf32>,
    %c0_139 = arith.constant 0 : index
    %c0_140 = arith.constant 0 : index
    %335 = vector.load %arg33[%c0_139, %c0_140] : memref<16x32xf32, #tpu.memory_space<vmem>>, vector<16x32xf32>
    %c0_141 = arith.constant 0 : index
    %c0_142 = arith.constant 0 : index
    %336 = vector.load %arg16[%c0_141, %c0_142] : memref<32x32xf32, #tpu.memory_space<vmem>>, vector<32x32xf32>
    %cst_143 = arith.constant dense<0.000000e+00> : vector<16x32xf32>
    %337 = tpu.matmul %335, %336, %cst_143 {dimension_numbers = #tpu.dot_dimension_numbers<[1], [0], [0], [1], [0, 0, 1, 1], [], []>} : vector<16x32xf32>, vector<32x32xf32>, vector<16x32xf32> -> vector<16x32xf32>
    %c0_144 = arith.constant 0 : index
    %c0_145 = arith.constant 0 : index
    %338 = vector.load %arg17[%c0_144, %c0_145] : memref<1x32xf32, #tpu.memory_space<vmem>>, vector<1x32xf32>
    %339 = vector.broadcast %338 : vector<1x32xf32> to vector<16x32xf32>
    %340 = arith.addf %337, %339 : vector<16x32xf32>
    %341 = arith.addf %201, %340 : vector<16x32xf32>
    %cst_146 = arith.constant dense<0.000000e+00> : vector<16xf32>
    %342 = vector.multi_reduction <add>, %341, %cst_146 [1] : vector<16x32xf32> to vector<16xf32>
    %343 = vector.shape_cast %342 : vector<16xf32> to vector<16x1xf32>
    %cst_147 = arith.constant 3.200000e+01 : f32
    %344 = vector.broadcast %cst_147 : f32 to vector<16x1xf32>
    %345 = arith.divf %343, %344 : vector<16x1xf32>
    %346 = vector.broadcast %345 : vector<16x1xf32> to vector<16x32xf32>
    %347 = arith.subf %341, %346 : vector<16x32xf32>
    %348 = arith.mulf %347, %347 : vector<16x32xf32>
    %cst_148 = arith.constant dense<0.000000e+00> : vector<16xf32>
    %349 = vector.multi_reduction <add>, %348, %cst_148 [1] : vector<16x32xf32> to vector<16xf32>
    %350 = vector.shape_cast %349 : vector<16xf32> to vector<16x1xf32>
    %cst_149 = arith.constant 3.200000e+01 : f32
    %351 = vector.broadcast %cst_149 : f32 to vector<16x1xf32>
    %352 = arith.divf %350, %351 : vector<16x1xf32>
    %353 = vector.broadcast %345 : vector<16x1xf32> to vector<16x32xf32>
    %354 = arith.subf %341, %353 : vector<16x32xf32>
    %cst_150 = arith.constant 9.99999974E-6 : f32
    %355 = vector.broadcast %cst_150 : f32 to vector<16x1xf32>
    %356 = arith.addf %352, %355 : vector<16x1xf32>
    %357 = math.rsqrt %356 : vector<16x1xf32>
    %358 = vector.broadcast %357 : vector<16x1xf32> to vector<16x32xf32>
    %359 = arith.mulf %354, %358 : vector<16x32xf32>
    %c0_151 = arith.constant 0 : index
    %c0_152 = arith.constant 0 : index
    %360 = vector.load %arg18[%c0_151, %c0_152] : memref<1x32xf32, #tpu.memory_space<vmem>>, vector<1x32xf32>
    %361 = vector.broadcast %360 : vector<1x32xf32> to vector<16x32xf32>
    %362 = arith.mulf %359, %361 : vector<16x32xf32>
    %c0_153 = arith.constant 0 : index
    %c0_154 = arith.constant 0 : index
    %363 = vector.load %arg19[%c0_153, %c0_154] : memref<1x32xf32, #tpu.memory_space<vmem>>, vector<1x32xf32>
    %364 = vector.broadcast %363 : vector<1x32xf32> to vector<16x32xf32>
    %365 = arith.addf %362, %364 : vector<16x32xf32>
    %c0_155 = arith.constant 0 : index
    %c0_156 = arith.constant 0 : index
    %366 = vector.load %arg20[%c0_155, %c0_156] : memref<32x64xf32, #tpu.memory_space<vmem>>, vector<32x64xf32>
    %cst_157 = arith.constant dense<0.000000e+00> : vector<16x64xf32>
    %367 = tpu.matmul %365, %366, %cst_157 {dimension_numbers = #tpu.dot_dimension_numbers<[1], [0], [0], [1], [0, 0, 1, 1], [], []>} : vector<16x32xf32>, vector<32x64xf32>, vector<16x64xf32> -> vector<16x64xf32>
    %c0_158 = arith.constant 0 : index
    %c0_159 = arith.constant 0 : index
    %368 = vector.load %arg21[%c0_158, %c0_159] : memref<1x64xf32, #tpu.memory_space<vmem>>, vector<1x64xf32>
    %369 = vector.broadcast %368 : vector<1x64xf32> to vector<16x64xf32>
    %370 = arith.addf %367, %369 : vector<16x64xf32>
    %cst_160 = arith.constant 0.000000e+00 : f32
    %371 = vector.broadcast %cst_160 : f32 to vector<16x64xf32>
    %372 = arith.maximumf %370, %371 : vector<16x64xf32>
    %c0_161 = arith.constant 0 : index
    %c0_162 = arith.constant 0 : index
    %373 = vector.load %arg22[%c0_161, %c0_162] : memref<64x32xf32, #tpu.memory_space<vmem>>, vector<64x32xf32>
    %cst_163 = arith.constant dense<0.000000e+00> : vector<16x32xf32>
    %374 = tpu.matmul %372, %373, %cst_163 {dimension_numbers = #tpu.dot_dimension_numbers<[1], [0], [0], [1], [0, 0, 1, 1], [], []>} : vector<16x64xf32>, vector<64x32xf32>, vector<16x32xf32> -> vector<16x32xf32>
    %c0_164 = arith.constant 0 : index
    %c0_165 = arith.constant 0 : index
    %375 = vector.load %arg23[%c0_164, %c0_165] : memref<1x32xf32, #tpu.memory_space<vmem>>, vector<1x32xf32>
    %376 = vector.broadcast %375 : vector<1x32xf32> to vector<16x32xf32>
    %377 = arith.addf %374, %376 : vector<16x32xf32>
    %378 = arith.addf %365, %377 : vector<16x32xf32>
    %cst_166 = arith.constant dense<0.000000e+00> : vector<16xf32>
    %379 = vector.multi_reduction <add>, %378, %cst_166 [1] : vector<16x32xf32> to vector<16xf32>
    %380 = vector.shape_cast %379 : vector<16xf32> to vector<16x1xf32>
    %cst_167 = arith.constant 3.200000e+01 : f32
    %381 = vector.broadcast %cst_167 : f32 to vector<16x1xf32>
    %382 = arith.divf %380, %381 : vector<16x1xf32>
    %383 = vector.broadcast %382 : vector<16x1xf32> to vector<16x32xf32>
    %384 = arith.subf %378, %383 : vector<16x32xf32>
    %385 = arith.mulf %384, %384 : vector<16x32xf32>
    %cst_168 = arith.constant dense<0.000000e+00> : vector<16xf32>
    %386 = vector.multi_reduction <add>, %385, %cst_168 [1] : vector<16x32xf32> to vector<16xf32>
    %387 = vector.shape_cast %386 : vector<16xf32> to vector<16x1xf32>
    %cst_169 = arith.constant 3.200000e+01 : f32
    %388 = vector.broadcast %cst_169 : f32 to vector<16x1xf32>
    %389 = arith.divf %387, %388 : vector<16x1xf32>
    %390 = vector.broadcast %382 : vector<16x1xf32> to vector<16x32xf32>
    %391 = arith.subf %378, %390 : vector<16x32xf32>
    %cst_170 = arith.constant 9.99999974E-6 : f32
    %392 = vector.broadcast %cst_170 : f32 to vector<16x1xf32>
    %393 = arith.addf %389, %392 : vector<16x1xf32>
    %394 = math.rsqrt %393 : vector<16x1xf32>
    %395 = vector.broadcast %394 : vector<16x1xf32> to vector<16x32xf32>
    %396 = arith.mulf %391, %395 : vector<16x32xf32>
    %c0_171 = arith.constant 0 : index
    %c0_172 = arith.constant 0 : index
    %397 = vector.load %arg24[%c0_171, %c0_172] : memref<1x32xf32, #tpu.memory_space<vmem>>, vector<1x32xf32>
    %398 = vector.broadcast %397 : vector<1x32xf32> to vector<16x32xf32>
    %399 = arith.mulf %396, %398 : vector<16x32xf32>
    %c0_173 = arith.constant 0 : index
    %c0_174 = arith.constant 0 : index
    %400 = vector.load %arg25[%c0_173, %c0_174] : memref<1x32xf32, #tpu.memory_space<vmem>>, vector<1x32xf32>
    %401 = vector.broadcast %400 : vector<1x32xf32> to vector<16x32xf32>
    %402 = arith.addf %399, %401 : vector<16x32xf32>
    %cst_175 = arith.constant dense<0.000000e+00> : vector<16xf32>
    %403 = vector.multi_reduction <add>, %402, %cst_175 [1] : vector<16x32xf32> to vector<16xf32>
    %404 = vector.shape_cast %403 : vector<16xf32> to vector<16x1xf32>
    %cst_176 = arith.constant 3.200000e+01 : f32
    %405 = vector.broadcast %cst_176 : f32 to vector<16x1xf32>
    %406 = arith.divf %404, %405 : vector<16x1xf32>
    %407 = vector.broadcast %406 : vector<16x1xf32> to vector<16x32xf32>
    %408 = arith.subf %402, %407 : vector<16x32xf32>
    %409 = arith.mulf %408, %408 : vector<16x32xf32>
    %cst_177 = arith.constant dense<0.000000e+00> : vector<16xf32>
    %410 = vector.multi_reduction <add>, %409, %cst_177 [1] : vector<16x32xf32> to vector<16xf32>
    %411 = vector.shape_cast %410 : vector<16xf32> to vector<16x1xf32>
    %cst_178 = arith.constant 3.200000e+01 : f32
    %412 = vector.broadcast %cst_178 : f32 to vector<16x1xf32>
    %413 = arith.divf %411, %412 : vector<16x1xf32>
    %414 = vector.broadcast %406 : vector<16x1xf32> to vector<16x32xf32>
    %415 = arith.subf %402, %414 : vector<16x32xf32>
    %cst_179 = arith.constant 9.99999974E-6 : f32
    %416 = vector.broadcast %cst_179 : f32 to vector<16x1xf32>
    %417 = arith.addf %413, %416 : vector<16x1xf32>
    %418 = math.rsqrt %417 : vector<16x1xf32>
    %419 = vector.broadcast %418 : vector<16x1xf32> to vector<16x32xf32>
    %420 = arith.mulf %415, %419 : vector<16x32xf32>
    %c0_180 = arith.constant 0 : index
    %c0_181 = arith.constant 0 : index
    %421 = vector.load %arg26[%c0_180, %c0_181] : memref<1x32xf32, #tpu.memory_space<vmem>>, vector<1x32xf32>
    %422 = vector.broadcast %421 : vector<1x32xf32> to vector<16x32xf32>
    %423 = arith.mulf %420, %422 : vector<16x32xf32>
    %c0_182 = arith.constant 0 : index
    %c0_183 = arith.constant 0 : index
    %424 = vector.load %arg27[%c0_182, %c0_183] : memref<1x32xf32, #tpu.memory_space<vmem>>, vector<1x32xf32>
    %425 = vector.broadcast %424 : vector<1x32xf32> to vector<16x32xf32>
    %426 = arith.addf %423, %425 : vector<16x32xf32>
    %c0_184 = arith.constant 0 : index
    %c0_185 = arith.constant 0 : index
    %427 = vector.load %arg28[%c0_184, %c0_185] : memref<32x32xf32, #tpu.memory_space<vmem>>, vector<32x32xf32>
    %cst_186 = arith.constant dense<0.000000e+00> : vector<16x32xf32>
    %428 = tpu.matmul %426, %427, %cst_186 {dimension_numbers = #tpu.dot_dimension_numbers<[1], [0], [0], [1], [0, 0, 1, 1], [], []>} : vector<16x32xf32>, vector<32x32xf32>, vector<16x32xf32> -> vector<16x32xf32>
    %c0_187 = arith.constant 0 : index
    %c0_188 = arith.constant 0 : index
    %429 = vector.load %arg29[%c0_187, %c0_188] : memref<1x32xf32, #tpu.memory_space<vmem>>, vector<1x32xf32>
    %430 = vector.broadcast %429 : vector<1x32xf32> to vector<16x32xf32>
    %431 = arith.addf %428, %430 : vector<16x32xf32>
    %cst_189 = arith.constant 0.000000e+00 : f32
    %432 = vector.broadcast %cst_189 : f32 to vector<16x32xf32>
    %433 = arith.maximumf %431, %432 : vector<16x32xf32>
    %cst_190 = arith.constant dense<0.000000e+00> : vector<16xf32>
    %434 = vector.multi_reduction <add>, %433, %cst_190 [1] : vector<16x32xf32> to vector<16xf32>
    %435 = vector.shape_cast %434 : vector<16xf32> to vector<16x1xf32>
    %cst_191 = arith.constant 3.200000e+01 : f32
    %436 = vector.broadcast %cst_191 : f32 to vector<16x1xf32>
    %437 = arith.divf %435, %436 : vector<16x1xf32>
    %438 = vector.broadcast %437 : vector<16x1xf32> to vector<16x32xf32>
    %439 = arith.subf %433, %438 : vector<16x32xf32>
    %440 = arith.mulf %439, %439 : vector<16x32xf32>
    %cst_192 = arith.constant dense<0.000000e+00> : vector<16xf32>
    %441 = vector.multi_reduction <add>, %440, %cst_192 [1] : vector<16x32xf32> to vector<16xf32>
    %442 = vector.shape_cast %441 : vector<16xf32> to vector<16x1xf32>
    %cst_193 = arith.constant 3.200000e+01 : f32
    %443 = vector.broadcast %cst_193 : f32 to vector<16x1xf32>
    %444 = arith.divf %442, %443 : vector<16x1xf32>
    %445 = vector.broadcast %437 : vector<16x1xf32> to vector<16x32xf32>
    %446 = arith.subf %433, %445 : vector<16x32xf32>
    %cst_194 = arith.constant 9.99999974E-6 : f32
    %447 = vector.broadcast %cst_194 : f32 to vector<16x1xf32>
    %448 = arith.addf %444, %447 : vector<16x1xf32>
    %449 = math.rsqrt %448 : vector<16x1xf32>
    %450 = vector.broadcast %449 : vector<16x1xf32> to vector<16x32xf32>
    %451 = arith.mulf %446, %450 : vector<16x32xf32>
    %c0_195 = arith.constant 0 : index
    %c0_196 = arith.constant 0 : index
    %452 = vector.load %arg30[%c0_195, %c0_196] : memref<1x32xf32, #tpu.memory_space<vmem>>, vector<1x32xf32>
    %453 = vector.broadcast %452 : vector<1x32xf32> to vector<16x32xf32>
    %454 = arith.mulf %451, %453 : vector<16x32xf32>
    %c0_197 = arith.constant 0 : index
    %c0_198 = arith.constant 0 : index
    %455 = vector.load %arg31[%c0_197, %c0_198] : memref<1x32xf32, #tpu.memory_space<vmem>>, vector<1x32xf32>
    %456 = vector.broadcast %455 : vector<1x32xf32> to vector<16x32xf32>
    %457 = arith.addf %454, %456 : vector<16x32xf32>
    %c0_199 = arith.constant 0 : index
    %c0_200 = arith.constant 0 : index
    %458 = vector.load %arg1[%c0_199, %c0_200] : memref<256x32xf32, #tpu.memory_space<vmem>>, vector<256x32xf32>
    %cst_201 = arith.constant dense<0.000000e+00> : vector<16x256xf32>
    %459 = tpu.matmul %457, %458, %cst_201 {dimension_numbers = #tpu.dot_dimension_numbers<[1], [1], [0], [0], [0, 0, 1, 0], [], []>} : vector<16x32xf32>, vector<256x32xf32>, vector<16x256xf32> -> vector<16x256xf32>
    %c0_202 = arith.constant 0 : index
    %c0_203 = arith.constant 0 : index
    %460 = vector.load %arg32[%c0_202, %c0_203] : memref<16x256xf32, #tpu.memory_space<vmem>>, vector<16x256xf32>
    tpu.vector_store %arg32[%c0_202, %c0_203], %459 {strides = array<i32>} : memref<16x256xf32, #tpu.memory_space<vmem>>, vector<16x256xf32>,
    return
  }
}

</mosaic_0001>

<bundles_post_ra>
// kernel: _forward_impl.1
= control target key start
LH: loop header
LB: loop body
LE: loop exit
PB: predicated region body
PF: predicated region fallthrough
CT: control target
= control target key end

     0   :  { %s2467_s6 = smov 1   ;;  %s2468_s10 = smov 2   ;;  %s3153_s0 = inlined_call_operand.smem [shape: u32[33], index: -1, kind: input, shape index: {}] }
   0x1   :  { %s2524_s5 = sld [smem:[%s3153_s0]]   ;;  %s2469_s14 = smov 3  }
   0x2   :  { %s2529_s9 = sld [smem:[%s3153_s0 + %s2467_s6]]   ;;  %s2470_s18 = smov 4  }
   0x3   :  { %s2534_s13 = sld [smem:[%s3153_s0 + %s2468_s10]]   ;;  %s2471_s22 = smov 5  }
   0x4   :  { %s2539_s17 = sld [smem:[%s3153_s0 + %s2469_s14]]   ;;  %s2472_s26 = smov 6  }
   0x5   :  { %s2544_s21 = sld [smem:[%s3153_s0 + %s2470_s18]]   ;;  %s2473_s30 = smov 7  }
   0x6   :  { %s2549_s25 = sld [smem:[%s3153_s0 + %s2471_s22]]   ;;  %s2474_s4 = smov 8  }
   0x7   :  { %s2554_s29 = sld [smem:[%s3153_s0 + %s2472_s26]]   ;;  %s2475_s10 = smov 9  }
   0x8   :  { %3159 = sst [smem:[#allocation6_spill]] %s2529_s9  ;;  %s2476_s15 = smov 10  }
   0x9   :  { %s2559_s3 = sld [smem:[%s3153_s0 + %s2473_s30]]   ;;  %s2477_s20 = smov 11  }
   0xa   :  { %s2564_s8 = sld [smem:[%s3153_s0 + %s2474_s4]]   ;;  %s2478_s26 = smov 12  }
   0xb   :  { %s2569_s14 = sld [smem:[%s3153_s0 + %s2475_s10]]   ;;  %s2479_s1 = smov 13  }
   0xc   :  { %s2574_s19 = sld [smem:[%s3153_s0 + %s2476_s15]]   ;;  %s2480_s7 = smov 14  }
   0xd   :  { %s2579_s24 = sld [smem:[%s3153_s0 + %s2477_s20]]   ;;  %s2481_s15 = smov 15  }
   0xe   :  { %s2584_s30 = sld [smem:[%s3153_s0 + %s2478_s26]]   ;;  %s2482_s22 = smov 16  }
   0xf   :  { %s2589_s6 = sld [smem:[%s3153_s0 + %s2479_s1]]   ;;  %s2483_s28 = smov 17  }
  0x10   :  { %s2594_s12 = sld [smem:[%s3153_s0 + %s2480_s7]]   ;;  %s2484_s7 = smov 18  }
  0x11   :  { %s2599_s20 = sld [smem:[%s3153_s0 + %s2481_s15]]   ;;  %s2485_s15 = smov 19  }
  0x12   :  { %s2604_s27 = sld [smem:[%s3153_s0 + %s2482_s22]]   ;;  %s2486_s22 = smov 20  }
  0x13   :  { %s2609_s4 = sld [smem:[%s3153_s0 + %s2483_s28]]   ;;  %s2487_s28 = smov 21  }
  0x14   :  { %s2614_s9 = sld [smem:[%s3153_s0 + %s2484_s7]]   ;;  %s2488_s7 = smov 22  }
  0x17   :  { %3160 = sst [smem:[#allocation7_spill]] %s2599_s20 }
  0x18   :  { %3161 = sst [smem:[#allocation8_spill]] %s2604_s27 }
  0x19   :  { %3162 = sst [smem:[#allocation9_spill]] %s2609_s4 }
  0x1a   :  { %3163 = sst [smem:[#allocation10_spill]] %s2614_s9 }
  0x1b   :  { %s2619_s20 = sld [smem:[%s3153_s0 + %s2485_s15]]   ;;  %s2489_s15 = smov 23  }
  0x1c   :  { %s2624_s27 = sld [smem:[%s3153_s0 + %s2486_s22]]   ;;  %s2490_s22 = smov 24  }
  0x1d   :  { %s2629_s4 = sld [smem:[%s3153_s0 + %s2487_s28]]   ;;  %s2491_s28 = smov 25  }
  0x1e   :  { %s2634_s9 = sld [smem:[%s3153_s0 + %s2488_s7]]   ;;  %s2492_s7 = smov 26  }
  0x21   :  { %3164 = sst [smem:[#allocation11_spill]] %s2619_s20 }
  0x22   :  { %3165 = sst [smem:[#allocation12_spill]] %s2624_s27 }
  0x23   :  { %3166 = sst [smem:[#allocation13_spill]] %s2629_s4 }
  0x24   :  { %3167 = sst [smem:[#allocation14_spill]] %s2634_s9 }
  0x25   :  { %s2639_s20 = sld [smem:[%s3153_s0 + %s2489_s15]]   ;;  %s2493_s15 = smov 27  }
  0x26   :  { %s2644_s27 = sld [smem:[%s3153_s0 + %s2490_s22]]   ;;  %s2494_s22 = smov 28  }
  0x27   :  { %s2649_s4 = sld [smem:[%s3153_s0 + %s2491_s28]]   ;;  %s2495_s28 = smov 29  }
  0x28   :  { %s2654_s9 = sld [smem:[%s3153_s0 + %s2492_s7]]   ;;  %s2496_s7 = smov 30  }
  0x2b   :  { %3168 = sst [smem:[#allocation15_spill]] %s2639_s20 }
  0x2c   :  { %3169 = sst [smem:[#allocation16_spill]] %s2644_s27 }
  0x2d   :  { %3170 = sst [smem:[#allocation17_spill]] %s2649_s4 }
  0x2e   :  { %3171 = sst [smem:[#allocation18_spill]] %s2654_s9 }
  0x2f   :  { %s2659_s20 = sld [smem:[%s3153_s0 + %s2493_s15]]   ;;  %s2497_s15 = smov 31  }
  0x30   :  { %s2664_s27 = sld [smem:[%s3153_s0 + %s2494_s22]]   ;;  %s2498_s22 = smov 32  }
  0x31   :  { %s2669_s4 = sld [smem:[%s3153_s0 + %s2495_s28]]  }
  0x32   :  { %s2674_s9 = sld [smem:[%s3153_s0 + %s2496_s7]]  }
  0x35   :  { %3172 = sst [smem:[#allocation19_spill]] %s2659_s20 }
  0x36   :  { %3173 = sst [smem:[#allocation20_spill]] %s2664_s27 }
  0x37   :  { %s2679_s20 = sld [smem:[%s3153_s0 + %s2497_s15]]  }
  0x38   :  { %s2684_s27 = sld [smem:[%s3153_s0 + %s2498_s22]]  }
  0x39   :  { %v140_v0 = vld [vmem:[%s2534_s13 + $0x18] sm:$0xff]  ;;  %v139_v1 = vld [vmem:[%s2534_s13 + $0x10] sm:$0xff]  ;;  %v138_v2 = vld [vmem:[%s2534_s13 + $0x8] sm:$0xff]  ;;  %vm145_vm0 = vcmask 261120  }
  0x3a   :  { %164 = vmatpush.msra.mxu1 %v140_v0  ;;  %v137_v3 = vld [vmem:[%s2534_s13] sm:$0xff] }
  0x3b   :  { %v2691_v4 = vld [vmem:[%s2524_s5] sm:$0xff] }
  0x3c   :  { %165 = vmatpush.msra.mxu1 %v139_v1 }
  0x3e   :  { %166 = vmatpush.msra.mxu1 %v138_v2 }
  0x40   :  { %167 = vmatpush.msra.mxu1 %v137_v3 }
  0x41   :  { %2179 = vmatmul.msk.f32.vlgmr.msra.gmra.mxu1 %vm145_vm0, %v2691_v4 }
  0x42   :  { %70 = vsyncpa [#allocation4], 0  ;;  %v2696_v5 = vld [vmem:[%s2539_s17] ss:$0 sm:$0xff]  ;;  %s2499_s0 = smov 88   ;;  %s2500_s13 = smov 96  }
  0x43   :  { %s2501_s28 = smov 120   ;;  %s2502_s1 = smov 80   ;;  %v2712_v8 = vld [vmem:[%s2524_s5 + $0x8] sm:$0xff]  ;;  %vm178_vm1 = vcmask 64512   ;;  %vm310_vm2 = vcmask 130112   ;;  %vm381_vm3 = vcmask 195712  }
  0x44   :  { %s2503_s17 = smov 112   ;;  %s2504_s5 = smov 64   ;;  %vm452_vm4 = vcmask 261312   ;;  %vm884_vm9 = vcmask 523264  }
  0x45   :  { %s2505_s2 = smov 48   ;;  %s2506_s7 = smov 56  }
  0x46   :  { %s2507_s10 = smov 104   ;;  %s2508_s11 = smov 72  }
  0x47   :  { %s2509_s15 = smov 40   ;;  %s2510_s16 = smov 16  }
  0x48   :  { %s2511_s18 = smov 8   ;;  %s2512_s22 = smov 24  }
  0x49   :  { %2180 = vmatmul.msk.f32.gmra.mxu1 %vm145_vm0, %v2712_v8  ;;  %s3185_s23 = sld [smem:[#allocation20_spill]] }
  0x4a   :  { %s3186_s26 = sld [smem:[#allocation18_spill]] }
  0xbe   :  { %v169_v6 = vpop.f32.mrf.mxu1 }
  0xbf   :  { %v2699_v7 = vadd.f32 %v2696_v5, %v169_v6 }
  0xc1   :  { %243 = vrot.lane.b32.xlu2 %v2699_v7, %s2499_s0  ;;  %176 = vrot.lane.b32.xlu0 %v2699_v7, %s2500_s13 }
  0xc6   :  { %v2721_v14 = vpop.f32.mrf.mxu1 }
  0xc7   :  { %v2747_v47 = vadd.f32 %v2696_v5, %v2721_v14 }
  0xc9   :  { %241 = vrot.lane.b32.xlu2 %v2699_v7, %s2501_s28 }
  0xd1   :  { %314 = vrot.lane.b32.xlu2 %v2699_v7, %s2502_s1 }
  0xd9   :  { %312 = vrot.lane.b32.xlu2 %v2699_v7, %s2503_s17 }
 0x11b   :  { %v244_v9 = vpop.permute.xlu2 %243 }
 0x123   :  { %v242_v10 = vpop.permute.xlu2 %241 }
 0x12b   :  { %v315_v12 = vpop.permute.xlu2 %314 }
 0x133   :  { %v177_v11 = vpop.permute.xlu0 %176  ;;  %v313_v13 = vpop.permute.xlu2 %312 }
 0x134   :  { %2181 = vmatpush.xpose.msk.msrb.mxu1 %vm178_vm1, %v177_v11 }
 0x137   :  { %2182 = vmatmul.msk.f32.vlgmr.msrb.gmra.mxu1 %vm178_vm1, %v2699_v7 }
 0x138   :  { %2187 = vmatpush.xpose.msk.msra.mxu1 %vm178_vm1, %v315_v12 }
 0x13f   :  { %2188 = vmatmul.msk.f32.vlgmr.msra.gmra.mxu1 %vm178_vm1, %v313_v13 }
 0x1b4   :  { %v200_v15 = vpop.f32.mrf.mxu1 }
 0x1b5   :  { %v203_v16 = vsel %vm178_vm1, %v200_v15, -inf }
 0x1b6   :  { %204 = vmax.xlane.f32.xlu0 %v203_v16 }
 0x1bc   :  { %v337_v22 = vpop.f32.mrf.mxu1 }
 0x1bd   :  { %v340_v23 = vsel %vm178_vm1, %v337_v22, -inf }
 0x229   :  { %v205_v17 = vpop.xlane.xlu0 %204 }
 0x22a   :  { %v206_v18 = vsub.f32 %v200_v15, %v205_v17 }
 0x22c   :  { %v207_v19 = vmul.f32 1.442695, %v206_v18 }
 0x22e   :  { %2351 = vpow2.f32 %v207_v19 }
 0x234   :  { %v2352_v20 = vpop.eup %2351 }
 0x235   :  { %v209_v21 = vsel %vm178_vm1, %v2352_v20, 0.0 }
 0x236   :  { %210 = vadd.xlane.f32.xlu1 %v209_v21 }
 0x24f   :  { %214 = vrot.lane.b32.xlu1 %v2699_v7, %s2504_s5 }
 0x279   :  { %341 = vmax.xlane.f32.xlu1 %v340_v23 }
 0x292   :  { %351 = vrot.lane.b32.xlu1 %v2699_v7, %s2505_s2 }
 0x2a9   :  { %v211_v24 = vpop.xlane.xlu1 %210 }
 0x2aa   :  { %2353 = vrcp.f32 %v211_v24 }
 0x2b0   :  { %v2354_v25 = vpop.eup %2353 }
 0x2b1   :  { %v213_v27 = vmul.f32 %v2354_v25, %v2352_v20 }
 0x2c1   :  { %v215_v26 = vpop.permute.xlu1 %214 }
 0x2c2   :  { %235 = vmatpush.msra.mxu3 %v215_v26 }
 0x2c3   :  { %2183 = vmatmul.msk.f32.vlgmr.msra.gmra.mxu3 %vm178_vm1, %v213_v27 }
 0x2c4   :  { %2184 = vmatpush.xpose.msk.msrb.mxu3 %vm178_vm1, %v244_v9 }
 0x2cb   :  { %2185 = vmatmul.msk.f32.vlgmr.msrb.gmra.mxu3 %vm178_vm1, %v242_v10 }
 0x2ec   :  { %v342_v28 = vpop.xlane.xlu1 %341 }
 0x2ed   :  { %v343_v29 = vsub.f32 %v337_v22, %v342_v28 }
 0x2ef   :  { %v344_v30 = vmul.f32 1.442695, %v343_v29 }
 0x2f1   :  { %2355 = vpow2.f32 %v344_v30 }
 0x2f7   :  { %v2356_v31 = vpop.eup %2355 }
 0x2f8   :  { %v346_v32 = vsel %vm178_vm1, %v2356_v31, 0.0 }
 0x2f9   :  { %347 = vadd.xlane.f32.xlu0 %v346_v32 }
 0x304   :  { %v352_v33 = vpop.permute.xlu1 %351 }
 0x305   :  { %372 = vmatpush.msra.mxu3 %v352_v33 }
 0x30d   :  { %280 = vrot.lane.b32.xlu0 %v2699_v7, %s2506_s7 }
 0x315   :  { %383 = vrot.lane.b32.xlu0 %v2699_v7, %s2507_s10 }
 0x346   :  { %v237_v34 = vpop.f32.mrf.mxu3 }
 0x347   :  { %240 = vst.msk [vmem:[#allocation2] sm:$0xff] %vm178_vm1, %v237_v34 }
 0x34e   :  { %v266_v35 = vpop.f32.mrf.mxu3 }
 0x34f   :  { %v269_v36 = vsel %vm178_vm1, %v266_v35, -inf }
 0x350   :  { %270 = vmax.xlane.f32.xlu2 %v269_v36 }
 0x368   :  { %385 = vrot.lane.b32.xlu2 %v2699_v7, %s2508_s11 }
 0x36c   :  { %v348_v37 = vpop.xlane.xlu0 %347 }
 0x36d   :  { %2357 = vrcp.f32 %v348_v37  ;;  %v734_v37 = vld [vmem:[%s2544_s21 + $0x18] sm:$0xff] }
 0x373   :  { %v2358_v38 = vpop.eup %2357 }
 0x374   :  { %v350_v39 = vmul.f32 %v2358_v38, %v2356_v31  ;;  %v733_v38 = vld [vmem:[%s2544_s21 + $0x10] sm:$0xff] }
 0x376   :  { %2189 = vmatmul.msk.f32.vlgmr.msra.gmra.mxu3 %vm178_vm1, %v350_v39 }
 0x37f   :  { %v281_v40 = vpop.permute.xlu0 %280 }
 0x380   :  { %301 = vmatpush.msra.mxu2 %v281_v40  ;;  %v732_v40 = vld [vmem:[%s2544_s21 + $0x8] sm:$0xff] }
 0x387   :  { %v384_v48 = vpop.permute.xlu0 %383 }
 0x3c3   :  { %v271_v41 = vpop.xlane.xlu2 %270 }
 0x3c4   :  { %v272_v42 = vsub.f32 %v266_v35, %v271_v41 }
 0x3c6   :  { %v273_v43 = vmul.f32 1.442695, %v272_v42 }
 0x3c8   :  { %2359 = vpow2.f32 %v273_v43  ;;  %v731_v43 = vld [vmem:[%s2544_s21] sm:$0xff]  ;;  %s3174_s21 = sld [smem:[#allocation7_spill]] }
 0x3cb   :  { %v386_v44 = vpop.permute.xlu2 %385 }
 0x3cc   :  { %2190 = vmatpush.xpose.msk.msrb.mxu2 %vm178_vm1, %v386_v44 }
 0x3ce   :  { %v2360_v45 = vpop.eup %2359 }
 0x3cf   :  { %v275_v46 = vsel %vm178_vm1, %v2360_v45, 0.0 }
 0x3d0   :  { %276 = vadd.xlane.f32.xlu0 %v275_v46 }
 0x3e4   :  { %455 = vrot.lane.b32.xlu0 %v2747_v47, %s2500_s13 }
 0x3ec   :  { %521 = vrot.lane.b32.xlu0 %v2747_v47, %s2499_s0 }
 0x3f4   :  { %519 = vrot.lane.b32.xlu0 %v2747_v47, %s2501_s28 }
 0x3f9   :  { %v374_v56 = vpop.f32.mrf.mxu3 }
 0x443   :  { %v277_v49 = vpop.xlane.xlu0 %276 }
 0x444   :  { %2361 = vrcp.f32 %v277_v49 }
 0x44a   :  { %v2362_v50 = vpop.eup %2361 }
 0x44b   :  { %v279_v51 = vmul.f32 %v2362_v50, %v2360_v45 }
 0x44d   :  { %2186 = vmatmul.msk.f32.vlgmr.msra.gmra.mxu2 %vm178_vm1, %v279_v51 }
 0x455   :  { %2191 = vmatmul.msk.f32.vlgmr.msrb.gmra.mxu2 %vm178_vm1, %v384_v48 }
 0x456   :  { %v456_v52 = vpop.permute.xlu0 %455 }
 0x457   :  { %2193 = vmatpush.xpose.msk.msrb.mxu3 %vm178_vm1, %v456_v52 }
 0x45a   :  { %2194 = vmatmul.msk.f32.vlgmr.msrb.gmra.mxu3 %vm178_vm1, %v2747_v47 }
 0x45e   :  { %v522_v53 = vpop.permute.xlu0 %521 }
 0x45f   :  { %2196 = vmatpush.xpose.msk.msra.mxu2 %vm178_vm1, %v522_v53 }
 0x466   :  { %v520_v54 = vpop.permute.xlu0 %519 }
 0x467   :  { %2197 = vmatmul.msk.f32.vlgmr.msra.gmra.mxu2 %vm178_vm1, %v520_v54 }
 0x4d0   :  { %v303_v55 = vpop.f32.mrf.mxu2 }
 0x4d8   :  { %v408_v57 = vpop.f32.mrf.mxu2 }
 0x4d9   :  { %v411_v58 = vsel %vm178_vm1, %v408_v57, -inf }
 0x4da   :  { %412 = vmax.xlane.f32.xlu2 %v411_v58  ;;  %v2811_v58 = vld [vmem:[%s2549_s25] ss:$0 sm:$0xff]  ;;  %s3175_s25 = sld [smem:[#allocation8_spill]] }
 0x4dd   :  { %v478_v59 = vpop.f32.mrf.mxu3 }
 0x4de   :  { %v481_v60 = vsel %vm178_vm1, %v478_v59, -inf }
 0x4df   :  { %482 = vmax.xlane.f32.xlu1 %v481_v60 }
 0x4ea   :  { %v544_v10 = vpop.f32.mrf.mxu2 }
 0x4eb   :  { %v547_v11 = vsel %vm178_vm1, %v544_v10, -inf }
 0x4f8   :  { %422 = vrot.lane.b32.xlu1 %v2699_v7, %s2509_s15 }
 0x500   :  { %591 = vrot.lane.b32.xlu1 %v2747_v47, %s2502_s1 }
 0x508   :  { %659 = vrot.lane.b32.xlu1 %v2747_v47, %s2507_s10 }
 0x54d   :  { %v413_v61 = vpop.xlane.xlu2 %412 }
 0x54e   :  { %v414_v62 = vsub.f32 %v408_v57, %v413_v61 }
 0x550   :  { %v415_v63 = vmul.f32 1.442695, %v414_v62 }
 0x552   :  { %2363 = vpow2.f32 %v415_v63  ;;  %v483_v0 = vpop.xlane.xlu1 %482 }
 0x553   :  { %v484_v1 = vsub.f32 %v478_v59, %v483_v0 }
 0x555   :  { %v485_v2 = vmul.f32 1.442695, %v484_v1 }
 0x557   :  { %2365 = vpow2.f32 %v485_v2 }
 0x558   :  { %v2364_v3 = vpop.eup %2363 }
 0x559   :  { %v417_v5 = vsel %vm178_vm1, %v2364_v3, 0.0 }
 0x55a   :  { %418 = vadd.xlane.f32.xlu0 %v417_v5 }
 0x55d   :  { %v2366_v6 = vpop.eup %2365 }
 0x55e   :  { %v487_v7 = vsel %vm178_vm1, %v2366_v6, 0.0 }
 0x55f   :  { %488 = vadd.xlane.f32.xlu2 %v487_v7  ;;  %v2513_v7 = vmov 32.0  }
 0x56a   :  { %v423_v9 = vpop.permute.xlu1 %422 }
 0x56b   :  { %443 = vmatpush.msrb.mxu1 %v423_v9 }
 0x56e   :  { %589 = vrot.lane.b32.xlu0 %v2747_v47, %s2503_s17 }
 0x572   :  { %v592_v19 = vpop.permute.xlu1 %591 }
 0x576   :  { %378 = vrot.lane.b32.xlu0 %v374_v56, %s2510_s16 }
 0x577   :  { %492 = vrot.lane.b32.xlu2 %v2747_v47, %s2504_s5 }
 0x57a   :  { %v660_v22 = vpop.permute.xlu1 %659 }
 0x57f   :  { %661 = vrot.lane.b32.xlu2 %v2747_v47, %s2508_s11 }
 0x587   :  { %307 = vrot.lane.b32.xlu2 %v303_v55, %s2511_s18 }
 0x5b0   :  { %548 = vmax.xlane.f32.xlu2 %v547_v11 }
 0x5cd   :  { %v419_v12 = vpop.xlane.xlu0 %418 }
 0x5ce   :  { %2367 = vrcp.f32 %v419_v12 }
 0x5d2   :  { %v489_v13 = vpop.xlane.xlu2 %488 }
 0x5d3   :  { %2369 = vrcp.f32 %v489_v13 }
 0x5d4   :  { %v2368_v14 = vpop.eup %2367 }
 0x5d5   :  { %v421_v15 = vmul.f32 %v2368_v14, %v2364_v3 }
 0x5d7   :  { %2192 = vmatmul.msk.f32.vlgmr.msrb.gmra.mxu1 %vm178_vm1, %v421_v15 }
 0x5d9   :  { %v2370_v16 = vpop.eup %2369 }
 0x5da   :  { %v491_v17 = vmul.f32 %v2370_v16, %v2366_v6  ;;  %v493_v18 = vpop.permute.xlu2 %492 }
 0x5db   :  { %513 = vmatpush.msra.mxu3 %v493_v18 }
 0x5dc   :  { %2195 = vmatmul.msk.f32.vlgmr.msra.gmra.mxu3 %vm178_vm1, %v491_v17 }
 0x5dd   :  { %2199 = vmatpush.xpose.msk.msrb.mxu3 %vm178_vm1, %v592_v19 }
 0x5e0   :  { %v590_v20 = vpop.permute.xlu0 %589 }
 0x5e1   :  { %757 = vmatpush.msra.mxu3 %v734_v37 }
 0x5e2   :  { %v662_v21 = vpop.permute.xlu2 %661 }
 0x5e3   :  { %2202 = vmatpush.xpose.msk.msrb.mxu2 %vm178_vm1, %v662_v21  ;;  %758 = vmatpush.msra.mxu3 %v733_v38  ;;  %v2834_v38 = vld [vmem:[%s2559_s3] ss:$0 sm:$0xff]  ;;  %s3177_s3 = sld [smem:[#allocation12_spill]] }
 0x5e4   :  { %2200 = vmatmul.msk.f32.vlgmr.msrb.gmra.mxu3 %vm178_vm1, %v590_v20 }
 0x5e5   :  { %759 = vmatpush.msra.mxu3 %v732_v40 }
 0x5e6   :  { %2203 = vmatmul.msk.f32.vlgmr.msrb.gmra.mxu2 %vm178_vm1, %v660_v22  ;;  %v836_v22 = vld [vmem:[%s2564_s8 + $0x18] sm:$0xff] }
 0x5e7   :  { %760 = vmatpush.msra.mxu3 %v731_v43  ;;  %v878_v43 = vld [vmem:[%s2574_s19 + $0x30] sm:$0xff] }
 0x5e8   :  { %v379_v24 = vpop.permute.xlu0 %378 }
 0x5ea   :  { %v308_v23 = vpop.permute.xlu2 %307 }
 0x5eb   :  { %311 = vst.msk [vmem:[#allocation2] sm:$0xff] %vm310_vm2, %v308_v23  ;;  %v835_v23 = vld [vmem:[%s2564_s8 + $0x10] sm:$0xff] }
 0x5ec   :  { %382 = vst.msk [vmem:[#allocation2] sm:$0xff] %vm381_vm3, %v379_v24  ;;  %v834_v24 = vld [vmem:[%s2564_s8 + $0x8] sm:$0xff] }
 0x623   :  { %v549_v25 = vpop.xlane.xlu2 %548 }
 0x624   :  { %v550_v26 = vsub.f32 %v544_v10, %v549_v25  ;;  %v833_v25 = vld [vmem:[%s2564_s8] sm:$0xff]  ;;  %s3178_s8 = sld [smem:[#allocation10_spill]] }
 0x626   :  { %v551_v27 = vmul.f32 1.442695, %v550_v26 }
 0x628   :  { %2371 = vpow2.f32 %v551_v27 }
 0x62e   :  { %v2372_v28 = vpop.eup %2371 }
 0x62f   :  { %v553_v29 = vsel %vm178_vm1, %v2372_v28, 0.0 }
 0x630   :  { %554 = vadd.xlane.f32.xlu2 %v553_v29 }
 0x648   :  { %558 = vrot.lane.b32.xlu2 %v2747_v47, %s2506_s7 }
 0x654   :  { %v445_v30 = vpop.f32.mrf.mxu1 }
 0x655   :  { %449 = vrot.lane.b32.xlu1 %v445_v30, %s2512_s22 }
 0x65f   :  { %v515_v31 = vpop.f32.mrf.mxu3 }
 0x660   :  { %518 = vst.msk [vmem:[#allocation2 + $0x8] sm:$0xff] %vm178_vm1, %v515_v31 }
 0x667   :  { %v614_v32 = vpop.f32.mrf.mxu3 }
 0x668   :  { %v617_v33 = vsel %vm178_vm1, %v614_v32, -inf }
 0x669   :  { %618 = vmax.xlane.f32.xlu0 %v617_v33  ;;  %v684_v34 = vpop.f32.mrf.mxu2 }
 0x66a   :  { %v687_v35 = vsel %vm178_vm1, %v684_v34, -inf }
 0x67f   :  { %688 = vmax.xlane.f32.xlu1 %v687_v35  ;;  %v2831_v35 = vld [vmem:[%s2554_s29] ss:$0 sm:$0xff]  ;;  %s3176_s29 = sld [smem:[#allocation9_spill]] }
 0x6a3   :  { %v555_v36 = vpop.xlane.xlu2 %554 }
 0x6a4   :  { %2373 = vrcp.f32 %v555_v36 }
 0x6aa   :  { %v2374_v39 = vpop.eup %2373 }
 0x6ab   :  { %v557_v41 = vmul.f32 %v2374_v39, %v2372_v28  ;;  %v559_v42 = vpop.permute.xlu2 %558 }
 0x6ac   :  { %579 = vmatpush.msra.mxu1 %v559_v42  ;;  %v879_v42 = vld [vmem:[%s2574_s19 + $0x38] sm:$0xff] }
 0x6ad   :  { %2198 = vmatmul.msk.f32.vlgmr.msra.gmra.mxu1 %vm178_vm1, %v557_v41  ;;  %899 = vmatpush.msrb.mxu3 %v879_v42 }
 0x6af   :  { %900 = vmatpush.msrb.mxu3 %v878_v43 }
 0x6c7   :  { %v450_v44 = vpop.permute.xlu1 %449 }
 0x6c8   :  { %453 = vst.msk [vmem:[#allocation2] sm:$0xff] %vm452_vm4, %v450_v44  ;;  %v877_v44 = vld [vmem:[%s2574_s19 + $0x28] sm:$0xff] }
 0x6c9   :  { %901 = vmatpush.msrb.mxu3 %v877_v44 }
 0x6cf   :  { %v729_v45 = vld [vmem:[#allocation2] sm:$0xff] }
 0x6d0   :  { %2205 = vmatmul.msk.f32.vlgmr.msra.gmra.mxu3 %vm145_vm0, %v729_v45  ;;  %v876_v45 = vld [vmem:[%s2574_s19 + $0x20] sm:$0xff] }
 0x6d1   :  { %902 = vmatpush.msrb.mxu3 %v876_v45 }
 0x6dc   :  { %v619_v46 = vpop.xlane.xlu0 %618 }
 0x6dd   :  { %v620_v48 = vsub.f32 %v614_v32, %v619_v46  ;;  %v875_v46 = vld [vmem:[%s2574_s19 + $0x18] sm:$0xff] }
 0x6de   :  { %903 = vmatpush.msrb.mxu3 %v875_v46 }
 0x6df   :  { %v621_v49 = vmul.f32 1.442695, %v620_v48 }
 0x6e1   :  { %2375 = vpow2.f32 %v621_v49 }
 0x6e7   :  { %v2376_v50 = vpop.eup %2375 }
 0x6e8   :  { %v623_v51 = vsel %vm178_vm1, %v2376_v50, 0.0 }
 0x6e9   :  { %624 = vadd.xlane.f32.xlu0 %v623_v51  ;;  %v873_v51 = vld [vmem:[%s2574_s19 + $0x8] sm:$0xff] }
 0x6f2   :  { %v689_v52 = vpop.xlane.xlu1 %688 }
 0x6f3   :  { %v690_v53 = vsub.f32 %v684_v34, %v689_v52  ;;  %v872_v52 = vld [vmem:[%s2574_s19] sm:$0xff] }
 0x6f5   :  { %v691_v54 = vmul.f32 1.442695, %v690_v53  ;;  %v2851_v53 = vld [vmem:[%s2569_s14] ss:$0 sm:$0xff]  ;;  %s3179_s14 = sld [smem:[#allocation11_spill]] }
 0x6f7   :  { %2377 = vpow2.f32 %v691_v54 }
 0x6fd   :  { %v2378_v55 = vpop.eup %2377  ;;  %628 = vrot.lane.b32.xlu0 %v2747_v47, %s2505_s2 }
 0x6fe   :  { %v693_v56 = vsel %vm178_vm1, %v2378_v55, 0.0 }
 0x6ff   :  { %694 = vadd.xlane.f32.xlu1 %v693_v56 }
 0x718   :  { %698 = vrot.lane.b32.xlu1 %v2747_v47, %s2509_s15 }
 0x72a   :  { %v581_v57 = vpop.f32.mrf.mxu1 }
 0x72b   :  { %585 = vrot.lane.b32.xlu1 %v581_v57, %s2511_s18 }
 0x753   :  { %v762_v59 = vpop.f32.mrf.mxu3 }
 0x754   :  { %v763_v60 = vadd.f32 %v2811_v58, %v762_v59 }
 0x756   :  { %v768_v61 = vadd.f32 %v763_v60, %v2691_v4 }
 0x758   :  { %v770_v62 = vsel %vm145_vm0, %v768_v61, 0.0 }
 0x759   :  { %771 = vadd.xlane.f32.xlu0 %v770_v62  ;;  %v2859_v62 = vld [vmem:[%s2579_s24] ss:$0 sm:$0xff]  ;;  %s3181_s24 = sld [smem:[#allocation13_spill]] }
 0x75c   :  { %v625_v63 = vpop.xlane.xlu0 %624 }
 0x75d   :  { %2379 = vrcp.f32 %v625_v63 }
 0x763   :  { %v2380_v0 = vpop.eup %2379 }
 0x764   :  { %v627_v2 = vmul.f32 %v2380_v0, %v2376_v50  ;;  %v874_v50 = vld [vmem:[%s2574_s19 + $0x10] sm:$0xff]  ;;  %s3180_s19 = sld [smem:[#allocation14_spill]] }
 0x765   :  { %904 = vmatpush.msrb.mxu3 %v874_v50 }
 0x767   :  { %905 = vmatpush.msrb.mxu3 %v873_v51 }
 0x769   :  { %906 = vmatpush.msrb.mxu3 %v872_v52 }
 0x76f   :  { %v629_v1 = vpop.permute.xlu0 %628 }
 0x770   :  { %649 = vmatpush.msra.mxu0 %v629_v1 }
 0x771   :  { %2201 = vmatmul.msk.f32.vlgmr.msra.gmra.mxu0 %vm178_vm1, %v627_v2 }
 0x772   :  { %v695_v47 = vpop.xlane.xlu1 %694  ;;  %859 = vmatpush.msrb.mxu0 %v836_v22 }
 0x773   :  { %2381 = vrcp.f32 %v695_v47 }
 0x774   :  { %2383 = vrcp.f32 %v2513_v7  ;;  %860 = vmatpush.msrb.mxu0 %v835_v23 }
 0x776   :  { %861 = vmatpush.msrb.mxu0 %v834_v24 }
 0x778   :  { %862 = vmatpush.msrb.mxu0 %v833_v25  ;;  %v975_v25 = vld [vmem:[%s2594_s12 + $0x18] sm:$0xff] }
 0x779   :  { %v2382_v3 = vpop.eup %2381 }
 0x77a   :  { %v697_v5 = vmul.f32 %v2382_v3, %v2378_v55  ;;  %v2384_v9 = vpop.eup %2383 }
 0x77b   :  { %v777_v10 = vmul.f32 32.0, %v2384_v9  ;;  %vm781_vm5 = vweird.f32 %v2384_v9 }
 0x77d   :  { %v778_v11 = vsub.f32 1.0, %v777_v10 }
 0x77f   :  { %v779_v12 = vmul.f32 %v2384_v9, %v778_v11 }
 0x781   :  { %v780_v13 = vadd.f32 %v2384_v9, %v779_v12 }
 0x783   :  { %v2819_v14 = vsel %vm781_vm5, %v2384_v9, %v780_v13 }
 0x78a   :  { %v699_v6 = vpop.permute.xlu1 %698 }
 0x78b   :  { %719 = vmatpush.msrb.mxu1 %v699_v6 }
 0x78c   :  { %2204 = vmatmul.msk.f32.vlgmr.msrb.gmra.mxu1 %vm178_vm1, %v697_v5 }
 0x78d   :  { %998 = vmatpush.msra.mxu1 %v975_v25 }
 0x79d   :  { %v586_v4 = vpop.permute.xlu1 %585 }
 0x79e   :  { %588 = vst.msk [vmem:[#allocation2 + $0x8] sm:$0xff] %vm310_vm2, %v586_v4 }
 0x7cc   :  { %v772_v15 = vpop.xlane.xlu0 %771 }
 0x7cd   :  { %v783_v16 = vmul.f32 %v2819_v14, %v772_v15 }
 0x7cf   :  { %v785_v17 = vsub.f32 %v768_v61, %v783_v16 }
 0x7d1   :  { %v787_v18 = vmul.f32 %v785_v17, %v785_v17 }
 0x7d3   :  { %v789_v19 = vsel %vm145_vm0, %v787_v18, 0.0 }
 0x7d4   :  { %790 = vadd.xlane.f32.xlu2 %v789_v19 }
 0x7ee   :  { %v651_v20 = vpop.f32.mrf.mxu0 }
 0x7ef   :  { %655 = vrot.lane.b32.xlu1 %v651_v20, %s2510_s16 }
 0x809   :  { %v721_v21 = vpop.f32.mrf.mxu1 }
 0x80a   :  { %725 = vrot.lane.b32.xlu1 %v721_v21, %s2512_s22 }
 0x847   :  { %v791_v26 = vpop.xlane.xlu2 %790 }
 0x848   :  { %v795_v27 = vmul.f32 %v791_v26, %v2819_v14  ;;  %v974_v26 = vld [vmem:[%s2594_s12 + $0x10] sm:$0xff] }
 0x849   :  { %999 = vmatpush.msra.mxu1 %v974_v26 }
 0x84a   :  { %v797_v28 = vadd.f32 1e-05, %v795_v27  ;;  %v973_v27 = vld [vmem:[%s2594_s12 + $0x8] sm:$0xff] }
 0x84b   :  { %1000 = vmatpush.msra.mxu1 %v973_v27 }
 0x84c   :  { %2385 = vrsqrt.f32 %v797_v28  ;;  %vm805_vm7 = vweird.f32 %v797_v28 }
 0x852   :  { %v2386_v29 = vpop.eup %2385 }
 0x853   :  { %v800_v30 = vmul.f32 %v2386_v29, %v797_v28  ;;  %vm806_vm6 = vweird.f32 %v2386_v29  ;;  %v972_v28 = vld [vmem:[%s2594_s12] sm:$0xff]  ;;  %s3184_s12 = sld [smem:[#allocation17_spill]] }
 0x854   :  { %vm807_vm8 = vmor %vm805_vm7, %vm806_vm6  ;;  %1001 = vmatpush.msra.mxu1 %v972_v28 }
 0x855   :  { %v801_v31 = vmul.f32 %v2386_v29, %v800_v30 }
 0x857   :  { %v802_v32 = vmul.f32 0.5, %v801_v31 }
 0x859   :  { %v803_v33 = vsub.f32 1.5, %v802_v32 }
 0x85b   :  { %v804_v34 = vmul.f32 %v2386_v29, %v803_v33 }
 0x85d   :  { %v808_v36 = vsel %vm807_vm8, %v2386_v29, %v804_v34 }
 0x85e   :  { %v819_v37 = vmul.f32 %v808_v36, %v785_v17 }
 0x860   :  { %v825_v39 = vmul.f32 %v2831_v35, %v819_v37 }
 0x861   :  { %v656_v40 = vpop.permute.xlu1 %655 }
 0x862   :  { %658 = vst.msk [vmem:[#allocation2 + $0x8] sm:$0xff] %vm381_vm3, %v656_v40  ;;  %v831_v41 = vadd.f32 %v2834_v38, %v825_v39 }
 0x864   :  { %2207 = vmatmul.msk.f32.vlgmr.msrb.gmra.mxu0 %vm145_vm0, %v831_v41 }
 0x87c   :  { %v726_v48 = vpop.permute.xlu1 %725 }
 0x87d   :  { %728 = vst.msk [vmem:[#allocation2 + $0x8] sm:$0xff] %vm452_vm4, %v726_v48  ;;  %v2338_v48 = vld [vmem:[%s3174_s21] ss:$0 sm:$0xff] }
 0x884   :  { %v730_v49 = vld [vmem:[#allocation2 + $0x8] sm:$0xff] }
 0x885   :  { %2206 = vmatmul.msk.f32.gmra.mxu3 %vm145_vm0, %v730_v49 }
 0x8e1   :  { %v864_v54 = vpop.f32.mrf.mxu0 }
 0x8e2   :  { %v865_v55 = vadd.f32 %v2851_v53, %v864_v54 }
 0x8e4   :  { %v870_v56 = vmax.f32 %v865_v55, 0.0 }
 0x8e6   :  { %2209 = vmatmul.msk.f32.vlgmr.msrb.gmra.mxu3 %vm884_vm9, %v870_v56 }
 0x908   :  { %v765_v57 = vpop.f32.mrf.mxu3 }
 0x909   :  { %v766_v59 = vadd.f32 %v2811_v58, %v765_v57 }
 0x90b   :  { %v769_v60 = vadd.f32 %v766_v59, %v2712_v8 }
 0x90d   :  { %v773_v61 = vsel %vm145_vm0, %v769_v60, 0.0 }
 0x90e   :  { %774 = vadd.xlane.f32.xlu1 %v773_v61 }
 0x969   :  { %v908_v63 = vpop.f32.mrf.mxu3 }
 0x96a   :  { %v909_v0 = vadd.f32 %v2859_v62, %v908_v63 }
 0x96c   :  { %v914_v1 = vadd.f32 %v909_v0, %v831_v41  ;;  %v2337_v41 = vld [vmem:[%s2589_s6] ss:$0 sm:$0xff]  ;;  %s3183_s6 = sld [smem:[#allocation16_spill]] }
 0x96e   :  { %v916_v2 = vsel %vm145_vm0, %v914_v1, 0.0 }
 0x96f   :  { %917 = vadd.xlane.f32.xlu2 %v916_v2 }
 0x981   :  { %v775_v47 = vpop.xlane.xlu1 %774 }
 0x982   :  { %v784_v3 = vmul.f32 %v2819_v14, %v775_v47 }
 0x984   :  { %v786_v5 = vsub.f32 %v769_v60, %v784_v3 }
 0x986   :  { %v788_v6 = vmul.f32 %v786_v5, %v786_v5 }
 0x988   :  { %v792_v58 = vsel %vm145_vm0, %v788_v6, 0.0 }
 0x989   :  { %793 = vadd.xlane.f32.xlu0 %v792_v58 }
 0x9e2   :  { %v918_v8 = vpop.xlane.xlu2 %917 }
 0x9e3   :  { %v922_v4 = vmul.f32 %v918_v8, %v2819_v14 }
 0x9e5   :  { %v924_v7 = vsub.f32 %v914_v1, %v922_v4 }
 0x9e7   :  { %v926_v9 = vmul.f32 %v924_v7, %v924_v7 }
 0x9e9   :  { %v928_v10 = vsel %vm145_vm0, %v926_v9, 0.0 }
 0x9ea   :  { %929 = vadd.xlane.f32.xlu0 %v928_v10 }
 0x9fc   :  { %v794_v11 = vpop.xlane.xlu0 %793 }
 0x9fd   :  { %v796_v12 = vmul.f32 %v794_v11, %v2819_v14 }
 0x9ff   :  { %v798_v13 = vadd.f32 1e-05, %v796_v12 }
 0xa01   :  { %2387 = vrsqrt.f32 %v798_v13  ;;  %vm815_vm11 = vweird.f32 %v798_v13 }
 0xa07   :  { %v2388_v15 = vpop.eup %2387 }
 0xa08   :  { %v810_v16 = vmul.f32 %v2388_v15, %v798_v13  ;;  %vm816_vm10 = vweird.f32 %v2388_v15 }
 0xa09   :  { %vm817_vm12 = vmor %vm815_vm11, %vm816_vm10 }
 0xa0a   :  { %v811_v17 = vmul.f32 %v2388_v15, %v810_v16 }
 0xa0c   :  { %v812_v18 = vmul.f32 0.5, %v811_v17 }
 0xa0e   :  { %v813_v19 = vsub.f32 1.5, %v812_v18 }
 0xa10   :  { %v814_v20 = vmul.f32 %v2388_v15, %v813_v19 }
 0xa12   :  { %v818_v21 = vsel %vm817_vm12, %v2388_v15, %v814_v20 }
 0xa13   :  { %v820_v22 = vmul.f32 %v818_v21, %v786_v5 }
 0xa15   :  { %v826_v23 = vmul.f32 %v2831_v35, %v820_v22 }
 0xa17   :  { %v832_v24 = vadd.f32 %v2834_v38, %v826_v23  ;;  %v2336_v38 = vld [vmem:[%s2584_s30] ss:$0 sm:$0xff]  ;;  %s3182_s30 = sld [smem:[#allocation15_spill]] }
 0xa19   :  { %2208 = vmatmul.msk.f32.gmra.mxu0 %vm145_vm0, %v832_v24 }
 0xa5d   :  { %v930_v29 = vpop.xlane.xlu0 %929 }
 0xa5e   :  { %v934_v30 = vmul.f32 %v930_v29, %v2819_v14 }
 0xa60   :  { %v936_v31 = vadd.f32 1e-05, %v934_v30 }
 0xa62   :  { %2389 = vrsqrt.f32 %v936_v31  ;;  %vm944_vm14 = vweird.f32 %v936_v31 }
 0xa68   :  { %v2390_v32 = vpop.eup %2389 }
 0xa69   :  { %v939_v33 = vmul.f32 %v2390_v32, %v936_v31  ;;  %vm945_vm13 = vweird.f32 %v2390_v32 }
 0xa6a   :  { %vm946_vm15 = vmor %vm944_vm14, %vm945_vm13 }
 0xa6b   :  { %v940_v34 = vmul.f32 %v2390_v32, %v939_v33 }
 0xa6d   :  { %v941_v35 = vmul.f32 0.5, %v940_v34 }
 0xa6f   :  { %v942_v36 = vsub.f32 1.5, %v941_v35 }
 0xa71   :  { %v943_v37 = vmul.f32 %v2390_v32, %v942_v36 }
 0xa73   :  { %v947_v39 = vsel %vm946_vm15, %v2390_v32, %v943_v37 }
 0xa74   :  { %v958_v40 = vmul.f32 %v947_v39, %v924_v7 }
 0xa76   :  { %v964_v42 = vmul.f32 %v2336_v38, %v958_v40 }
 0xa78   :  { %v2878_v43 = vadd.f32 %v2337_v41, %v964_v42 }
 0xa7a   :  { %2211 = vmatmul.msk.f32.vlgmr.msra.gmra.mxu1 %vm145_vm0, %v2878_v43 }
 0xa96   :  { %v867_v44 = vpop.f32.mrf.mxu0 }
 0xa97   :  { %v868_v45 = vadd.f32 %v2851_v53, %v867_v44 }
 0xa99   :  { %v871_v46 = vmax.f32 %v868_v45, 0.0 }
 0xa9b   :  { %2210 = vmatmul.msk.f32.gmra.mxu3 %vm884_vm9, %v871_v46 }
 0xaf7   :  { %v1003_v49 = vpop.f32.mrf.mxu1 }
 0xaf8   :  { %v2885_v50 = vadd.f32 %v2338_v48, %v1003_v49 }
 0xafa   :  { %1074 = vrot.lane.b32.xlu1 %v2885_v50, %s2501_s28  ;;  %1010 = vrot.lane.b32.xlu2 %v2885_v50, %s2500_s13 }
 0xb02   :  { %1076 = vrot.lane.b32.xlu2 %v2885_v50, %s2499_s0 }
 0xb0a   :  { %1146 = vrot.lane.b32.xlu2 %v2885_v50, %s2502_s1 }
 0xb12   :  { %1216 = vrot.lane.b32.xlu2 %v2885_v50, %s2508_s11 }
 0xb1a   :  { %1144 = vrot.lane.b32.xlu2 %v2885_v50, %s2503_s17 }
 0xb1e   :  { %v911_v51 = vpop.f32.mrf.mxu3 }
 0xb1f   :  { %v912_v52 = vadd.f32 %v2859_v62, %v911_v51 }
 0xb21   :  { %v915_v53 = vadd.f32 %v912_v52, %v832_v24 }
 0xb23   :  { %v919_v54 = vsel %vm145_vm0, %v915_v53, 0.0 }
 0xb24   :  { %920 = vadd.xlane.f32.xlu0 %v919_v54 }
 0xb54   :  { %v1011_v55 = vpop.permute.xlu2 %1010 }
 0xb55   :  { %2213 = vmatpush.xpose.msk.msra.mxu3 %vm178_vm1, %v1011_v55 }
 0xb58   :  { %2214 = vmatmul.msk.f32.vlgmr.msra.gmra.mxu3 %vm178_vm1, %v2885_v50 }
 0xb5c   :  { %v1077_v56 = vpop.permute.xlu2 %1076 }
 0xb5d   :  { %2216 = vmatpush.xpose.msk.msrb.mxu1 %vm178_vm1, %v1077_v56 }
 0xb64   :  { %v1147_v57 = vpop.permute.xlu2 %1146 }
 0xb6c   :  { %v1217_v59 = vpop.permute.xlu2 %1216  ;;  %v1075_v15 = vpop.permute.xlu1 %1074 }
 0xb6d   :  { %2222 = vmatpush.xpose.msk.msra.mxu1 %vm178_vm1, %v1217_v59 }
 0xb74   :  { %v1145_v31 = vpop.permute.xlu2 %1144 }
 0xb97   :  { %v921_v60 = vpop.xlane.xlu0 %920 }
 0xb98   :  { %v923_v61 = vmul.f32 %v921_v60, %v2819_v14 }
 0xb9a   :  { %v925_v62 = vsub.f32 %v915_v53, %v923_v61 }
 0xb9c   :  { %v927_v63 = vmul.f32 %v925_v62, %v925_v62 }
 0xb9e   :  { %v931_v0 = vsel %vm145_vm0, %v927_v63, 0.0 }
 0xb9f   :  { %932 = vadd.xlane.f32.xlu0 %v931_v0 }
 0xbdb   :  { %v1033_v1 = vpop.f32.mrf.mxu3 }
 0xbdc   :  { %v1036_v2 = vsel %vm178_vm1, %v1033_v1, -inf }
 0xbdd   :  { %1037 = vmax.xlane.f32.xlu0 %v1036_v2 }
 0xbf1   :  { %1047 = vrot.lane.b32.xlu0 %v2885_v50, %s2504_s5 }
 0xbf9   :  { %1214 = vrot.lane.b32.xlu0 %v2885_v50, %s2507_s10 }
 0xc12   :  { %v933_v47 = vpop.xlane.xlu0 %932 }
 0xc13   :  { %v935_v3 = vmul.f32 %v933_v47, %v2819_v14 }
 0xc15   :  { %v937_v5 = vadd.f32 1e-05, %v935_v3 }
 0xc17   :  { %2391 = vrsqrt.f32 %v937_v5  ;;  %vm954_vm6 = vweird.f32 %v937_v5 }
 0xc1d   :  { %v2392_v6 = vpop.eup %2391 }
 0xc1e   :  { %v949_v58 = vmul.f32 %v2392_v6, %v937_v5  ;;  %vm955_vm5 = vweird.f32 %v2392_v6 }
 0xc1f   :  { %vm956_vm7 = vmor %vm954_vm6, %vm955_vm5 }
 0xc20   :  { %v950_v8 = vmul.f32 %v2392_v6, %v949_v58 }
 0xc22   :  { %v951_v4 = vmul.f32 0.5, %v950_v8 }
 0xc24   :  { %v952_v7 = vsub.f32 1.5, %v951_v4 }
 0xc26   :  { %v953_v9 = vmul.f32 %v2392_v6, %v952_v7 }
 0xc28   :  { %v957_v10 = vsel %vm956_vm7, %v2392_v6, %v953_v9 }
 0xc29   :  { %v959_v11 = vmul.f32 %v957_v10, %v925_v62 }
 0xc2b   :  { %v965_v12 = vmul.f32 %v2336_v38, %v959_v11 }
 0xc2d   :  { %v2914_v13 = vadd.f32 %v2337_v41, %v965_v12 }
 0xc2f   :  { %2212 = vmatmul.msk.f32.gmra.mxu1 %vm145_vm0, %v2914_v13 }
 0xc37   :  { %2217 = vmatmul.msk.f32.vlgmr.msrb.gmra.mxu1 %vm178_vm1, %v1075_v15 }
 0xc50   :  { %v1038_v16 = vpop.xlane.xlu0 %1037 }
 0xc51   :  { %v1039_v21 = vsub.f32 %v1033_v1, %v1038_v16 }
 0xc53   :  { %v1040_v22 = vmul.f32 1.442695, %v1039_v21 }
 0xc55   :  { %2393 = vpow2.f32 %v1040_v22 }
 0xc5b   :  { %v2394_v23 = vpop.eup %2393 }
 0xc5c   :  { %v1042_v24 = vsel %vm178_vm1, %v2394_v23, 0.0 }
 0xc63   :  { %v1048_v17 = vpop.permute.xlu0 %1047 }
 0xc64   :  { %1068 = vmatpush.msra.mxu0 %v1048_v17 }
 0xc66   :  { %2219 = vmatpush.xpose.msk.msrb.mxu0 %vm178_vm1, %v1147_v57 }
 0xc6b   :  { %v1215_v18 = vpop.permute.xlu0 %1214 }
 0xc6c   :  { %2223 = vmatmul.msk.f32.vlgmr.msra.gmra.mxu1 %vm178_vm1, %v1215_v18 }
 0xcac   :  { %v1006_v19 = vpop.f32.mrf.mxu1 }
 0xcad   :  { %v2921_v20 = vadd.f32 %v2338_v48, %v1006_v19 }
 0xcaf   :  { %1349 = vrot.lane.b32.xlu0 %v2921_v20, %s2501_s28  ;;  %1351 = vrot.lane.b32.xlu1 %v2921_v20, %s2499_s0  ;;  %s3187_s0 = sld [smem:[#allocation19_spill]] }
 0xcb0   :  { %1285 = vrot.lane.b32.xlu2 %v2921_v20, %s2500_s13  ;;  %s3188_s13 = sld [smem:[#allocation6_spill]] }
 0xcb4   :  { %v1099_v25 = vpop.f32.mrf.mxu1 }
 0xcb5   :  { %v1102_v28 = vsel %vm178_vm1, %v1099_v25, -inf }
 0xcb7   :  { %1419 = vrot.lane.b32.xlu0 %v2921_v20, %s2503_s17  ;;  %s2457_s17 = scalar_lea.hbm %s2684_s27, 32 }
 0xcb8   :  { %1421 = vrot.lane.b32.xlu2 %v2921_v20, %s2502_s1 }
 0xcc0   :  { %1489 = vrot.lane.b32.xlu2 %v2921_v20, %s2507_s10 }
 0xcd9   :  { %1043 = vadd.xlane.f32.xlu1 %v1042_v24 }
 0xce9   :  { %v1239_v26 = vpop.f32.mrf.mxu1 }
 0xcea   :  { %v1242_v27 = vsel %vm178_vm1, %v1239_v26, -inf }
 0xceb   :  { %1243 = vmax.xlane.f32.xlu2 %v1242_v27 }
 0xcf2   :  { %1491 = vrot.lane.b32.xlu1 %v2921_v20, %s2508_s11 }
 0xd0a   :  { %v1286_v34 = vpop.permute.xlu2 %1285 }
 0xd12   :  { %v1422_v36 = vpop.permute.xlu2 %1421 }
 0xd1a   :  { %v1490_v38 = vpop.permute.xlu2 %1489 }
 0xd1c   :  { %1103 = vmax.xlane.f32.xlu1 %v1102_v28 }
 0xd21   :  { %v1352_v29 = vpop.permute.xlu1 %1351  ;;  %v1350_v30 = vpop.permute.xlu0 %1349 }
 0xd22   :  { %2228 = vmatpush.xpose.msk.msrb.mxu1 %vm178_vm1, %v1352_v29 }
 0xd25   :  { %2229 = vmatmul.msk.f32.vlgmr.msrb.gmra.mxu1 %vm178_vm1, %v1350_v30 }
 0xd29   :  { %v1420_v39 = vpop.permute.xlu0 %1419 }
 0xd4c   :  { %v1044_v32 = vpop.xlane.xlu1 %1043 }
 0xd4d   :  { %2395 = vrcp.f32 %v1044_v32 }
 0xd53   :  { %v2396_v33 = vpop.eup %2395 }
 0xd54   :  { %v1046_v35 = vmul.f32 %v2396_v33, %v2394_v23 }
 0xd56   :  { %2215 = vmatmul.msk.f32.vlgmr.msra.gmra.mxu0 %vm178_vm1, %v1046_v35 }
 0xd57   :  { %2225 = vmatpush.xpose.msk.msra.mxu0 %vm178_vm1, %v1286_v34 }
 0xd5e   :  { %2220 = vmatmul.msk.f32.vlgmr.msrb.gmra.mxu0 %vm178_vm1, %v1145_v31  ;;  %v1244_v48 = vpop.xlane.xlu2 %1243 }
 0xd5f   :  { %2231 = vmatpush.xpose.msk.msrb.mxu0 %vm178_vm1, %v1422_v36  ;;  %v1245_v52 = vsub.f32 %v1239_v26, %v1244_v48 }
 0xd61   :  { %v1246_v54 = vmul.f32 1.442695, %v1245_v52 }
 0xd64   :  { %v1492_v37 = vpop.permute.xlu1 %1491 }
 0xd65   :  { %2234 = vmatpush.xpose.msk.msra.mxu1 %vm178_vm1, %v1492_v37 }
 0xd66   :  { %2226 = vmatmul.msk.f32.vlgmr.msra.gmra.mxu0 %vm178_vm1, %v2921_v20 }
 0xd68   :  { %2235 = vmatmul.msk.f32.vlgmr.msra.gmra.mxu1 %vm178_vm1, %v1490_v38 }
 0xd6e   :  { %2232 = vmatmul.msk.f32.vlgmr.msrb.gmra.mxu0 %vm178_vm1, %v1420_v39 }
 0xd8f   :  { %v1104_v42 = vpop.xlane.xlu1 %1103 }
 0xd90   :  { %v1105_v44 = vsub.f32 %v1099_v25, %v1104_v42 }
 0xd92   :  { %v1106_v46 = vmul.f32 1.442695, %v1105_v44 }
 0xd94   :  { %2397 = vpow2.f32 %v1106_v46 }
 0xd95   :  { %2399 = vpow2.f32 %v1246_v54 }
 0xd9a   :  { %v2398_v53 = vpop.eup %2397 }
 0xd9b   :  { %v1108_v55 = vsel %vm178_vm1, %v2398_v53, 0.0  ;;  %v2400_v59 = vpop.eup %2399 }
 0xd9c   :  { %v1248_v60 = vsel %vm178_vm1, %v2400_v59, 0.0 }
 0xda2   :  { %v1374_v40 = vpop.f32.mrf.mxu1 }
 0xda3   :  { %v1377_v41 = vsel %vm178_vm1, %v1374_v40, -inf }
 0xda4   :  { %1378 = vmax.xlane.f32.xlu0 %v1377_v41 }
 0xdd3   :  { %v1070_v45 = vpop.f32.mrf.mxu0 }
 0xdd4   :  { %1073 = vst.msk [vmem:[#allocation2] sm:$0xff] %vm178_vm1, %v1070_v45 }
 0xddb   :  { %v1169_v49 = vpop.f32.mrf.mxu0 }
 0xddc   :  { %v1172_v51 = vsel %vm178_vm1, %v1169_v49, -inf }
 0xddd   :  { %1173 = vmax.xlane.f32.xlu0 %v1172_v51 }
 0xde3   :  { %v1308_v2 = vpop.f32.mrf.mxu0 }
 0xde4   :  { %v1311_v47 = vsel %vm178_vm1, %v1308_v2, -inf }
 0xde5   :  { %v1514_v56 = vpop.f32.mrf.mxu1  ;;  %1109 = vadd.xlane.f32.xlu0 %v1108_v55 }
 0xde6   :  { %v1517_v57 = vsel %vm178_vm1, %v1514_v56, -inf }
 0xde7   :  { %1518 = vmax.xlane.f32.xlu1 %v1517_v57 }
 0xdeb   :  { %v1444_v4 = vpop.f32.mrf.mxu0 }
 0xdec   :  { %v1447_v9 = vsel %vm178_vm1, %v1444_v4, -inf }
 0xdef   :  { %1249 = vadd.xlane.f32.xlu1 %v1248_v60 }
 0xdf9   :  { %1113 = vrot.lane.b32.xlu0 %v2885_v50, %s2506_s7 }
 0xe08   :  { %1183 = vrot.lane.b32.xlu1 %v2885_v50, %s2505_s2 }
 0xe17   :  { %v1379_v61 = vpop.xlane.xlu0 %1378 }
 0xe18   :  { %v1380_v62 = vsub.f32 %v1374_v40, %v1379_v61  ;;  %v1564_v61 = vld [vmem:[%s3175_s25 + $0x18] sm:$0xff] }
 0xe19   :  { %1587 = vmatpush.msra.mxu0 %v1564_v61 }
 0xe1a   :  { %v1381_v63 = vmul.f32 1.442695, %v1380_v62  ;;  %v1563_v62 = vld [vmem:[%s3175_s25 + $0x10] sm:$0xff] }
 0xe1b   :  { %1588 = vmatpush.msra.mxu0 %v1563_v62 }
 0xe1c   :  { %2401 = vpow2.f32 %v1381_v63 }
 0xe22   :  { %v2961_v0 = vpop.eup %2401 }
 0xe23   :  { %v1383_v1 = vsel %vm178_vm1, %v2961_v0, 0.0 }
 0xe24   :  { %1384 = vadd.xlane.f32.xlu2 %v1383_v1  ;;  %v1562_v1 = vld [vmem:[%s3175_s25 + $0x8] sm:$0xff] }
 0xe25   :  { %1589 = vmatpush.msra.mxu0 %v1562_v1 }
 0xe32   :  { %1312 = vmax.xlane.f32.xlu1 %v1311_v47 }
 0xe3c   :  { %1253 = vrot.lane.b32.xlu2 %v2885_v50, %s2509_s15 }
 0xe4b   :  { %1322 = vrot.lane.b32.xlu1 %v2921_v20, %s2504_s5 }
 0xe50   :  { %v1174_v3 = vpop.xlane.xlu0 %1173 }
 0xe51   :  { %v1175_v5 = vsub.f32 %v1169_v49, %v1174_v3 }
 0xe53   :  { %v1176_v6 = vmul.f32 1.442695, %v1175_v5 }
 0xe58   :  { %v1110_v58 = vpop.xlane.xlu0 %1109 }
 0xe59   :  { %2403 = vrcp.f32 %v1110_v58 }
 0xe5a   :  { %v1519_v8 = vpop.xlane.xlu1 %1518  ;;  %2405 = vpow2.f32 %v1176_v6 }
 0xe5b   :  { %v1520_v7 = vsub.f32 %v1514_v56, %v1519_v8 }
 0xe5d   :  { %v1521_v10 = vmul.f32 1.442695, %v1520_v7 }
 0xe5f   :  { %v2404_v11 = vpop.eup %2403  ;;  %2407 = vpow2.f32 %v1521_v10 }
 0xe60   :  { %v2406_v12 = vpop.eup %2405  ;;  %v1112_v15 = vmul.f32 %v2404_v11, %v2398_v53 }
 0xe61   :  { %v1178_v16 = vsel %vm178_vm1, %v2406_v12, 0.0 }
 0xe62   :  { %v1250_v18 = vpop.xlane.xlu1 %1249 }
 0xe63   :  { %2409 = vrcp.f32 %v1250_v18 }
 0xe65   :  { %1448 = vmax.xlane.f32.xlu2 %v1447_v9  ;;  %v2408_v17 = vpop.eup %2407 }
 0xe66   :  { %v1523_v19 = vsel %vm178_vm1, %v2408_v17, 0.0 }
 0xe69   :  { %v2410_v23 = vpop.eup %2409 }
 0xe6a   :  { %v1252_v24 = vmul.f32 %v2410_v23, %v2400_v59 }
 0xe6b   :  { %v1114_v50 = vpop.permute.xlu0 %1113 }
 0xe6c   :  { %1134 = vmatpush.msrb.mxu3 %v1114_v50 }
 0xe6d   :  { %1179 = vadd.xlane.f32.xlu2 %v1178_v16  ;;  %2218 = vmatmul.msk.f32.vlgmr.msrb.gmra.mxu3 %vm178_vm1, %v1112_v15 }
 0xe75   :  { %1524 = vadd.xlane.f32.xlu1 %v1523_v19 }
 0xe7a   :  { %v1184_v21 = vpop.permute.xlu1 %1183 }
 0xe7b   :  { %1204 = vmatpush.msra.mxu2 %v1184_v21 }
 0xe97   :  { %v1385_v22 = vpop.xlane.xlu2 %1384 }
 0xe9f   :  { %v1254_v25 = vpop.permute.xlu2 %1253 }
 0xea0   :  { %1274 = vmatpush.msra.mxu3 %v1254_v25  ;;  %v1659_v25 = vld [vmem:[%s3177_s3 + $0x18] sm:$0xff] }
 0xea1   :  { %2224 = vmatmul.msk.f32.vlgmr.msra.gmra.mxu3 %vm178_vm1, %v1252_v24 }
 0xea5   :  { %v1313_v26 = vpop.xlane.xlu1 %1312 }
 0xea6   :  { %v1314_v27 = vsub.f32 %v1308_v2, %v1313_v26  ;;  %v1561_v2 = vld [vmem:[%s3175_s25] sm:$0xff]  ;;  %v1658_v26 = vld [vmem:[%s3177_s3 + $0x10] sm:$0xff] }
 0xea7   :  { %1590 = vmatpush.msra.mxu0 %v1561_v2 }
 0xea8   :  { %v1315_v28 = vmul.f32 1.442695, %v1314_v27  ;;  %v1657_v27 = vld [vmem:[%s3177_s3 + $0x8] sm:$0xff] }
 0xeaa   :  { %2411 = vpow2.f32 %v1315_v28  ;;  %v1656_v28 = vld [vmem:[%s3177_s3] sm:$0xff] }
 0xeb0   :  { %v2412_v29 = vpop.eup %2411 }
 0xeb1   :  { %v1317_v30 = vsel %vm178_vm1, %v2412_v29, 0.0 }
 0xeb2   :  { %1318 = vadd.xlane.f32.xlu2 %v1317_v30 }
 0xebd   :  { %v1323_v31 = vpop.permute.xlu1 %1322 }
 0xebe   :  { %1343 = vmatpush.msrb.mxu2 %v1323_v31 }
 0xeca   :  { %1388 = vrot.lane.b32.xlu2 %v2921_v20, %s2506_s7 }
 0xed2   :  { %1458 = vrot.lane.b32.xlu2 %v2921_v20, %s2505_s2 }
 0xed8   :  { %v1449_v32 = vpop.xlane.xlu2 %1448 }
 0xed9   :  { %v1450_v33 = vsub.f32 %v1444_v4, %v1449_v32  ;;  %v2339_v4 = vld [vmem:[%s3176_s29] ss:$0 sm:$0xff] }
 0xeda   :  { %1528 = vrot.lane.b32.xlu2 %v2921_v20, %s2509_s15 }
 0xedb   :  { %v1451_v34 = vmul.f32 1.442695, %v1450_v33 }
 0xedd   :  { %2413 = vpow2.f32 %v1451_v34 }
 0xee0   :  { %v1180_v35 = vpop.xlane.xlu2 %1179 }
 0xee1   :  { %2415 = vrcp.f32 %v1180_v35 }
 0xee2   :  { %2417 = vrcp.f32 %v1385_v22 }
 0xee3   :  { %v2414_v36 = vpop.eup %2413 }
 0xee4   :  { %v1453_v37 = vsel %vm178_vm1, %v2414_v36, 0.0 }
 0xee5   :  { %1454 = vadd.xlane.f32.xlu0 %v1453_v37 }
 0xee7   :  { %v2416_v38 = vpop.eup %2415 }
 0xee8   :  { %v1182_v39 = vmul.f32 %v2416_v38, %v2406_v12  ;;  %v2418_v42 = vpop.eup %2417  ;;  %v1525_v48 = vpop.xlane.xlu1 %1524 }
 0xee9   :  { %v1387_v44 = vmul.f32 %v2418_v42, %v2961_v0 }
 0xeea   :  { %2221 = vmatmul.msk.f32.vlgmr.msra.gmra.mxu2 %vm178_vm1, %v1182_v39 }
 0xef0   :  { %v1136_v40 = vpop.f32.mrf.mxu3 }
 0xef9   :  { %1140 = vrot.lane.b32.xlu0 %v1136_v40, %s2511_s18 }
 0xf24   :  { %v1276_v60 = vpop.f32.mrf.mxu3 }
 0xf25   :  { %v1319_v41 = vpop.xlane.xlu2 %1318 }
 0xf26   :  { %2419 = vrcp.f32 %v1319_v41  ;;  %v2340_v41 = vld [vmem:[%s3178_s8] ss:$0 sm:$0xff] }
 0xf27   :  { %2421 = vrcp.f32 %v1525_v48 }
 0xf2c   :  { %v2420_v20 = vpop.eup %2419 }
 0xf2d   :  { %v1321_v45 = vmul.f32 %v2420_v20, %v2412_v29  ;;  %v1389_v46 = vpop.permute.xlu2 %1388  ;;  %v2422_v51 = vpop.eup %2421 }
 0xf2e   :  { %1409 = vmatpush.msrb.mxu3 %v1389_v46  ;;  %v1527_v52 = vmul.f32 %v2422_v51, %v2408_v17  ;;  %v1701_v51 = vld [vmem:[%s3180_s19 + $0x30] sm:$0xff] }
 0xf2f   :  { %2227 = vmatmul.msk.f32.vlgmr.msrb.gmra.mxu2 %vm178_vm1, %v1321_v45  ;;  %2230 = vmatmul.msk.f32.vlgmr.msrb.gmra.mxu3 %vm178_vm1, %v1387_v44  ;;  %v2341_v45 = vld [vmem:[%s3179_s14] ss:$0 sm:$0xff] }
 0xf35   :  { %v1459_v49 = vpop.permute.xlu2 %1458 }
 0xf36   :  { %1479 = vmatpush.msra.mxu2 %v1459_v49  ;;  %v1702_v49 = vld [vmem:[%s3180_s19 + $0x38] sm:$0xff] }
 0xf37   :  { %1721 = vmatpush.msrb.mxu1 %v1702_v49 }
 0xf38   :  { %1682 = vmatpush.msrb.mxu2 %v1659_v25 }
 0xf39   :  { %1722 = vmatpush.msrb.mxu1 %v1701_v51 }
 0xf3a   :  { %1683 = vmatpush.msrb.mxu2 %v1658_v26 }
 0xf3c   :  { %1684 = vmatpush.msrb.mxu2 %v1657_v27 }
 0xf3d   :  { %v1529_v53 = vpop.permute.xlu2 %1528 }
 0xf3e   :  { %1549 = vmatpush.msra.mxu3 %v1529_v53  ;;  %1685 = vmatpush.msrb.mxu2 %v1656_v28  ;;  %v1699_v53 = vld [vmem:[%s3180_s19 + $0x20] sm:$0xff] }
 0xf3f   :  { %2236 = vmatmul.msk.f32.vlgmr.msra.gmra.mxu3 %vm178_vm1, %v1527_v52  ;;  %v1700_v52 = vld [vmem:[%s3180_s19 + $0x28] sm:$0xff] }
 0xf40   :  { %1723 = vmatpush.msrb.mxu1 %v1700_v52 }
 0xf42   :  { %1724 = vmatpush.msrb.mxu1 %v1699_v53 }
 0xf58   :  { %v1455_v54 = vpop.xlane.xlu0 %1454 }
 0xf59   :  { %2423 = vrcp.f32 %v1455_v54  ;;  %v1698_v54 = vld [vmem:[%s3180_s19 + $0x18] sm:$0xff] }
 0xf5a   :  { %1725 = vmatpush.msrb.mxu1 %v1698_v54 }
 0xf5f   :  { %v2424_v55 = vpop.eup %2423 }
 0xf60   :  { %v1457_v56 = vmul.f32 %v2424_v55, %v2414_v36  ;;  %v1697_v55 = vld [vmem:[%s3180_s19 + $0x10] sm:$0xff] }
 0xf61   :  { %1726 = vmatpush.msrb.mxu1 %v1697_v55 }
 0xf62   :  { %2233 = vmatmul.msk.f32.vlgmr.msra.gmra.mxu2 %vm178_vm1, %v1457_v56  ;;  %v1696_v56 = vld [vmem:[%s3180_s19 + $0x8] sm:$0xff] }
 0xf63   :  { %1727 = vmatpush.msrb.mxu1 %v1696_v56 }
 0xf6b   :  { %v1141_v57 = vpop.permute.xlu0 %1140 }
 0xf6c   :  { %1143 = vst.msk [vmem:[#allocation2] sm:$0xff] %vm310_vm2, %v1141_v57  ;;  %v1695_v57 = vld [vmem:[%s3180_s19] sm:$0xff] }
 0xf6d   :  { %v1206_v59 = vpop.f32.mrf.mxu2  ;;  %1728 = vmatpush.msrb.mxu1 %v1695_v57 }
 0xf6e   :  { %1210 = vrot.lane.b32.xlu2 %v1206_v59, %s2510_s16 }
 0xf76   :  { %1280 = vrot.lane.b32.xlu2 %v1276_v60, %s2512_s22 }
 0xfb2   :  { %v1345_v63 = vpop.f32.mrf.mxu2  ;;  %v1411_v0 = vpop.f32.mrf.mxu3 }
 0xfb3   :  { %1348 = vst.msk [vmem:[#allocation2 + $0x8] sm:$0xff] %vm178_vm1, %v1345_v63  ;;  %1415 = vrot.lane.b32.xlu1 %v1411_v0, %s2511_s18 }
 0xfc2   :  { %v1551_v47 = vpop.f32.mrf.mxu3 }
 0xfc3   :  { %1555 = vrot.lane.b32.xlu2 %v1551_v47, %s2512_s22 }
 0xfc8   :  { %v1211_v3 = vpop.permute.xlu2 %1210 }
 0xfc9   :  { %1213 = vst.msk [vmem:[#allocation2] sm:$0xff] %vm381_vm3, %v1211_v3  ;;  %v2342_v3 = vld [vmem:[%s3181_s24] ss:$0 sm:$0xff] }
 0xfd0   :  { %v1281_v5 = vpop.permute.xlu2 %1280 }
 0xfd1   :  { %1283 = vst.msk [vmem:[#allocation2] sm:$0xff] %vm452_vm4, %v1281_v5 }
 0xfd8   :  { %v1559_v6 = vld [vmem:[#allocation2] sm:$0xff] }
 0xfd9   :  { %2237 = vmatmul.msk.f32.vlgmr.msra.gmra.mxu0 %vm145_vm0, %v1559_v6 }
 0xfe5   :  { %v1481_v58 = vpop.f32.mrf.mxu2 }
 0xfe6   :  { %1485 = vrot.lane.b32.xlu0 %v1481_v58, %s2510_s16 }
0x101d   :  { %v1556_v11 = vpop.permute.xlu2 %1555 }
0x1025   :  { %v1416_v8 = vpop.permute.xlu1 %1415 }
0x1026   :  { %1418 = vst.msk [vmem:[#allocation2 + $0x8] sm:$0xff] %vm310_vm2, %v1416_v8 }
0x1056   :  { %v1592_v7 = vpop.f32.mrf.mxu0 }
0x1057   :  { %v1593_v9 = vadd.f32 %v2339_v4, %v1592_v7 }
0x1058   :  { %v1486_v10 = vpop.permute.xlu0 %1485 }
0x1059   :  { %1488 = vst.msk [vmem:[#allocation2 + $0x8] sm:$0xff] %vm381_vm3, %v1486_v10  ;;  %v1598_v12 = vadd.f32 %v1593_v9, %v2878_v43  ;;  %v2343_v10 = vld [vmem:[%s3182_s30] ss:$0 sm:$0xff] }
0x105a   :  { %1558 = vst.msk [vmem:[#allocation2 + $0x8] sm:$0xff] %vm452_vm4, %v1556_v11 }
0x105b   :  { %v1600_v15 = vsel %vm145_vm0, %v1598_v12, 0.0 }
0x105c   :  { %1601 = vadd.xlane.f32.xlu0 %v1600_v15 }
0x1061   :  { %v1560_v50 = vld [vmem:[#allocation2 + $0x8] sm:$0xff] }
0x1062   :  { %2238 = vmatmul.msk.f32.gmra.mxu0 %vm145_vm0, %v1560_v50 }
0x10cf   :  { %v1602_v16 = vpop.xlane.xlu0 %1601 }
0x10d0   :  { %v1606_v17 = vmul.f32 %v1602_v16, %v2819_v14 }
0x10d2   :  { %v1608_v18 = vsub.f32 %v1598_v12, %v1606_v17 }
0x10d4   :  { %v1610_v19 = vmul.f32 %v1608_v18, %v1608_v18 }
0x10d6   :  { %v1612_v21 = vsel %vm145_vm0, %v1610_v19, 0.0 }
0x10d7   :  { %1613 = vadd.xlane.f32.xlu1 %v1612_v21 }
0x10df   :  { %v1595_v43 = vpop.f32.mrf.mxu0 }
0x10e0   :  { %v1596_v22 = vadd.f32 %v2339_v4, %v1595_v43 }
0x10e2   :  { %v1599_v23 = vadd.f32 %v1596_v22, %v2914_v13 }
0x10e4   :  { %v1603_v24 = vsel %vm145_vm0, %v1599_v23, 0.0 }
0x10e5   :  { %1604 = vadd.xlane.f32.xlu2 %v1603_v24 }
0x114a   :  { %v1614_v29 = vpop.xlane.xlu1 %1613 }
0x114b   :  { %v1618_v30 = vmul.f32 %v1614_v29, %v2819_v14 }
0x114d   :  { %v1620_v31 = vadd.f32 1e-05, %v1618_v30 }
0x114f   :  { %2425 = vrsqrt.f32 %v1620_v31  ;;  %vm1628_vm2 = vweird.f32 %v1620_v31 }
0x1155   :  { %v2426_v32 = vpop.eup %2425 }
0x1156   :  { %v1623_v33 = vmul.f32 %v2426_v32, %v1620_v31  ;;  %vm1629_vm1 = vweird.f32 %v2426_v32 }
0x1157   :  { %vm1630_vm3 = vmor %vm1628_vm2, %vm1629_vm1 }
0x1158   :  { %v1624_v13 = vmul.f32 %v2426_v32, %v1623_v33  ;;  %v1605_v34 = vpop.xlane.xlu2 %1604 }
0x1159   :  { %v1607_v35 = vmul.f32 %v1605_v34, %v2819_v14 }
0x115a   :  { %v1625_v36 = vmul.f32 0.5, %v1624_v13 }
0x115b   :  { %v1609_v37 = vsub.f32 %v1599_v23, %v1607_v35 }
0x115c   :  { %v1626_v38 = vsub.f32 1.5, %v1625_v36 }
0x115d   :  { %v1611_v39 = vmul.f32 %v1609_v37, %v1609_v37 }
0x115e   :  { %v1627_v40 = vmul.f32 %v2426_v32, %v1626_v38 }
0x115f   :  { %v1615_v42 = vsel %vm145_vm0, %v1611_v39, 0.0 }
0x1160   :  { %v1631_v20 = vsel %vm1630_vm3, %v2426_v32, %v1627_v40  ;;  %1616 = vadd.xlane.f32.xlu0 %v1615_v42 }
0x1161   :  { %v1642_v44 = vmul.f32 %v1631_v20, %v1608_v18 }
0x1163   :  { %v1648_v46 = vmul.f32 %v2340_v41, %v1642_v44  ;;  %v2345_v44 = vld [vmem:[%s3184_s12] ss:$0 sm:$0xff] }
0x1165   :  { %v1654_v48 = vadd.f32 %v2341_v45, %v1648_v46 }
0x1167   :  { %2239 = vmatmul.msk.f32.vlgmr.msrb.gmra.mxu2 %vm145_vm0, %v1654_v48 }
0x11d3   :  { %v1617_v59 = vpop.xlane.xlu0 %1616 }
0x11d4   :  { %v1619_v60 = vmul.f32 %v1617_v59, %v2819_v14 }
0x11d6   :  { %v1621_v61 = vadd.f32 1e-05, %v1619_v60 }
0x11d8   :  { %2427 = vrsqrt.f32 %v1621_v61  ;;  %vm1638_vm8 = vweird.f32 %v1621_v61 }
0x11de   :  { %v2428_v62 = vpop.eup %2427 }
0x11df   :  { %v1633_v63 = vmul.f32 %v2428_v62, %v1621_v61  ;;  %vm1639_vm4 = vweird.f32 %v2428_v62 }
0x11e0   :  { %vm1640_vm10 = vmor %vm1638_vm8, %vm1639_vm4 }
0x11e1   :  { %v1634_v0 = vmul.f32 %v2428_v62, %v1633_v63 }
0x11e3   :  { %v1635_v1 = vmul.f32 0.5, %v1634_v0 }
0x11e5   :  { %v1636_v2 = vsub.f32 1.5, %v1635_v1 }
0x11e7   :  { %v1637_v47 = vmul.f32 %v2428_v62, %v1636_v2 }
0x11e9   :  { %v1641_v5 = vsel %vm1640_vm10, %v2428_v62, %v1637_v47 }
0x11ea   :  { %v1687_v6 = vpop.f32.mrf.mxu2  ;;  %v1643_v58 = vmul.f32 %v1641_v5, %v1609_v37 }
0x11eb   :  { %v1688_v8 = vadd.f32 %v2342_v3, %v1687_v6  ;;  %v1853_v6 = vld [vmem:[%s3185_s23 + $0x18] sm:$0xff] }
0x11ec   :  { %v1649_v4 = vmul.f32 %v2340_v41, %v1643_v58  ;;  %v2344_v41 = vld [vmem:[%s3183_s6] ss:$0 sm:$0xff]  ;;  %1876 = vmatpush.msrb.mxu3 %v1853_v6  ;;  %v1852_v58 = vld [vmem:[%s3185_s23 + $0x10] sm:$0xff] }
0x11ed   :  { %v1693_v7 = vmax.f32 %v1688_v8, 0.0  ;;  %v1851_v8 = vld [vmem:[%s3185_s23 + $0x8] sm:$0xff]  ;;  %v1969_v6 = vld [vmem:[%s3188_s13 + $0xc0] sm:$0xff] }
0x11ee   :  { %v1655_v9 = vadd.f32 %v2341_v45, %v1649_v4  ;;  %1877 = vmatpush.msrb.mxu3 %v1852_v58  ;;  %v1850_v4 = vld [vmem:[%s3185_s23] sm:$0xff] }
0x11ef   :  { %2241 = vmatmul.msk.f32.vlgmr.msrb.gmra.mxu1 %vm884_vm9, %v1693_v7 }
0x11f0   :  { %2240 = vmatmul.msk.f32.gmra.mxu2 %vm145_vm0, %v1655_v9  ;;  %1878 = vmatpush.msrb.mxu3 %v1851_v8 }
0x11f2   :  { %1879 = vmatpush.msrb.mxu3 %v1850_v4  ;;  %v1952_v4 = vld [vmem:[%s3188_s13 + $0x38] sm:$0xff] }
0x126c   :  { %v1730_v11 = vpop.f32.mrf.mxu1 }
0x126d   :  { %v1731_v12 = vadd.f32 %v2343_v10, %v1730_v11 }
0x126f   :  { %v1736_v15 = vadd.f32 %v1731_v12, %v1654_v48 }
0x1271   :  { %v1738_v50 = vsel %vm145_vm0, %v1736_v15, 0.0 }
0x1272   :  { %1739 = vadd.xlane.f32.xlu2 %v1738_v50 }
0x1273   :  { %v1690_v16 = vpop.f32.mrf.mxu2 }
0x1274   :  { %v1691_v17 = vadd.f32 %v2342_v3, %v1690_v16 }
0x1276   :  { %v1694_v18 = vmax.f32 %v1691_v17, 0.0 }
0x1278   :  { %2242 = vmatmul.msk.f32.gmra.mxu1 %vm884_vm9, %v1694_v18 }
0x12e5   :  { %v1740_v19 = vpop.xlane.xlu2 %1739 }
0x12e6   :  { %v1744_v21 = vmul.f32 %v1740_v19, %v2819_v14 }
0x12e8   :  { %v1746_v43 = vsub.f32 %v1736_v15, %v1744_v21 }
0x12ea   :  { %v1748_v22 = vmul.f32 %v1746_v43, %v1746_v43 }
0x12ec   :  { %v1750_v23 = vsel %vm145_vm0, %v1748_v22, 0.0  ;;  %v2346_v22 = vld [vmem:[%s3186_s26] ss:$0 sm:$0xff] }
0x12ed   :  { %1751 = vadd.xlane.f32.xlu2 %v1750_v23 }
0x12f5   :  { %v1733_v24 = vpop.f32.mrf.mxu1 }
0x12f6   :  { %v1734_v25 = vadd.f32 %v2343_v10, %v1733_v24 }
0x12f8   :  { %v1737_v26 = vadd.f32 %v1734_v25, %v1655_v9 }
0x12fa   :  { %v1741_v27 = vsel %vm145_vm0, %v1737_v26, 0.0 }
0x12fb   :  { %1742 = vadd.xlane.f32.xlu0 %v1741_v27 }
0x1360   :  { %v1752_v28 = vpop.xlane.xlu2 %1751 }
0x1361   :  { %v1756_v29 = vmul.f32 %v1752_v28, %v2819_v14 }
0x1363   :  { %v1758_v30 = vadd.f32 1e-05, %v1756_v29 }
0x1365   :  { %2429 = vrsqrt.f32 %v1758_v30  ;;  %vm1766_vm11 = vweird.f32 %v1758_v30 }
0x136b   :  { %v2430_v31 = vpop.eup %2429 }
0x136c   :  { %v1761_v32 = vmul.f32 %v2430_v31, %v1758_v30  ;;  %vm1767_vm9 = vweird.f32 %v2430_v31 }
0x136d   :  { %vm1768_vm12 = vmor %vm1766_vm11, %vm1767_vm9 }
0x136e   :  { %v1762_v33 = vmul.f32 %v2430_v31, %v1761_v32  ;;  %v1743_v13 = vpop.xlane.xlu0 %1742 }
0x136f   :  { %v1745_v34 = vmul.f32 %v1743_v13, %v2819_v14 }
0x1370   :  { %v1763_v35 = vmul.f32 0.5, %v1762_v33 }
0x1371   :  { %v1747_v36 = vsub.f32 %v1737_v26, %v1745_v34  ;;  %v2347_v26 = vld [vmem:[%s3187_s0] ss:$0 sm:$0xff] }
0x1372   :  { %v1764_v37 = vsub.f32 1.5, %v1763_v35 }
0x1373   :  { %v1749_v38 = vmul.f32 %v1747_v36, %v1747_v36 }
0x1374   :  { %v1765_v39 = vmul.f32 %v2430_v31, %v1764_v37  ;;  %v2348_v37 = vld [vmem:[%s2669_s4] ss:$0 sm:$0xff]  ;;  %s2135_s4 = sshll.u32 %s2684_s27, 4  ;;  %s2136_s4 = int_to_ptr.hbm [resolvable:$true] %s2135_s4 }
0x1375   :  { %v1753_v40 = vsel %vm145_vm0, %v1749_v38, 0.0  ;;  %s2453_s28 = sshra.s32 %s2136_s4, 4  ;;  %s2454_s28 = int_to_ptr.hbm [resolvable:$true] %s2453_s28 }
0x1376   :  { %1754 = vadd.xlane.f32.xlu1 %v1753_v40  ;;  %v1769_v42 = vsel %vm1768_vm12, %v2430_v31, %v1765_v39  ;;  %s2455_s1 = scalar_lea.hbm %s2454_s28, 32  ;;  %p2458_p1 = scmp.lt.s32.totalorder %s2454_s28, %s2684_s27 }
0x1377   :  { %v1780_v20 = vmul.f32 %v1769_v42, %v1746_v43  ;;  %p2456_p0 = scmp.ne.s32.totalorder %s2454_s28, %s2455_s1  ;;  %p2459_p2 = scmp.lt.s32.totalorder %s2457_s17, %s2455_s1 }
0x1379   :  { %v1786_v45 = vmul.f32 %v2344_v41, %v1780_v20  ;;  %p2460_p3 = por %p2459_p2, %p2458_p1 }
0x137b   :  { %v1792_v46 = vadd.f32 %v2345_v44, %v1786_v45  ;;  %p2461_p4 = pnand %p2460_p3, %p2456_p0 }
0x137d   :  { %v1794_v48 = vsel %vm145_vm0, %v1792_v46, 0.0 }
0x137e   :  { %1795 = vadd.xlane.f32.xlu0 %v1794_v48  ;;  %v1976_v48 = vld [vmem:[%s3188_s13 + $0xf8] sm:$0xff] }
0x137f   :  { %2263 = vmatpush.xpose.msk.msra.mxu2 %vm145_vm0, %v1976_v48 }
0x13e9   :  { %v1755_v49 = vpop.xlane.xlu1 %1754 }
0x13ea   :  { %v1757_v51 = vmul.f32 %v1755_v49, %v2819_v14  ;;  %v1959_v49 = vld [vmem:[%s3188_s13 + $0x70] sm:$0xff] }
0x13ec   :  { %v1759_v52 = vadd.f32 1e-05, %v1757_v51  ;;  %v1975_v51 = vld [vmem:[%s3188_s13 + $0xf0] sm:$0xff] }
0x13ed   :  { %2264 = vmatpush.xpose.msk.msra.mxu2 %vm145_vm0, %v1975_v51 }
0x13ee   :  { %2431 = vrsqrt.f32 %v1759_v52  ;;  %vm1776_vm14 = vweird.f32 %v1759_v52 }
0x13f1   :  { %v1796_v53 = vpop.xlane.xlu0 %1795 }
0x13f2   :  { %v1800_v54 = vmul.f32 %v1796_v53, %v2819_v14  ;;  %v1974_v53 = vld [vmem:[%s3188_s13 + $0xe8] sm:$0xff] }
0x13f3   :  { %2265 = vmatpush.xpose.msk.msra.mxu2 %vm145_vm0, %v1974_v53 }
0x13f4   :  { %v2432_v55 = vpop.eup %2431  ;;  %v1802_v56 = vsub.f32 %v1792_v46, %v1800_v54  ;;  %v1960_v46 = vld [vmem:[%s3188_s13 + $0x78] sm:$0xff] }
0x13f5   :  { %v1771_v57 = vmul.f32 %v2432_v55, %v1759_v52  ;;  %vm1777_vm13 = vweird.f32 %v2432_v55  ;;  %2245 = vmatpush.xpose.msk.msrb.mxu0 %vm145_vm0, %v1960_v46  ;;  %v1958_v52 = vld [vmem:[%s3188_s13 + $0x68] sm:$0xff] }
0x13f6   :  { %v1804_v59 = vmul.f32 %v1802_v56, %v1802_v56  ;;  %vm1778_vm15 = vmor %vm1776_vm14, %vm1777_vm13 }
0x13f7   :  { %v1772_v60 = vmul.f32 %v2432_v55, %v1771_v57 }
0x13f8   :  { %v1806_v61 = vsel %vm145_vm0, %v1804_v59, 0.0 }
0x13f9   :  { %v1773_v62 = vmul.f32 0.5, %v1772_v60  ;;  %1807 = vadd.xlane.f32.xlu1 %v1806_v61  ;;  %2246 = vmatpush.xpose.msk.msrb.mxu0 %vm145_vm0, %v1959_v49  ;;  %v1956_v60 = vld [vmem:[%s3188_s13 + $0x58] sm:$0xff] }
0x13fa   :  { %v1972_v61 = vld [vmem:[%s3188_s13 + $0xd8] sm:$0xff] }
0x13fb   :  { %v1774_v63 = vsub.f32 1.5, %v1773_v62 }
0x13fd   :  { %v1775_v0 = vmul.f32 %v2432_v55, %v1774_v63  ;;  %2247 = vmatpush.xpose.msk.msrb.mxu0 %vm145_vm0, %v1958_v52 }
0x13ff   :  { %v1779_v1 = vsel %vm1778_vm15, %v2432_v55, %v1775_v0  ;;  %v1957_v55 = vld [vmem:[%s3188_s13 + $0x60] sm:$0xff]  ;;  %v1955_v0 = vld [vmem:[%s3188_s13 + $0x50] sm:$0xff] }
0x1400   :  { %v1781_v2 = vmul.f32 %v1779_v1, %v1747_v36  ;;  %v1971_v1 = vld [vmem:[%s3188_s13 + $0xd0] sm:$0xff] }
0x1401   :  { %2248 = vmatpush.xpose.msk.msrb.mxu0 %vm145_vm0, %v1957_v55 }
0x1402   :  { %v1787_v47 = vmul.f32 %v2344_v41, %v1781_v2  ;;  %v1954_v2 = vld [vmem:[%s3188_s13 + $0x48] sm:$0xff] }
0x1404   :  { %v1793_v3 = vadd.f32 %v2345_v44, %v1787_v47  ;;  %v1970_v47 = vld [vmem:[%s3188_s13 + $0xc8] sm:$0xff] }
0x1405   :  { %2249 = vmatpush.xpose.msk.msrb.mxu0 %vm145_vm0, %v1956_v60 }
0x1406   :  { %v1797_v5 = vsel %vm145_vm0, %v1793_v3, 0.0 }
0x1407   :  { %1798 = vadd.xlane.f32.xlu2 %v1797_v5  ;;  %v1953_v5 = vld [vmem:[%s3188_s13 + $0x40] sm:$0xff] }
0x1409   :  { %2250 = vmatpush.xpose.msk.msrb.mxu0 %vm145_vm0, %v1955_v0 }
0x140d   :  { %2251 = vmatpush.xpose.msk.msrb.mxu0 %vm145_vm0, %v1954_v2 }
0x1411   :  { %2252 = vmatpush.xpose.msk.msrb.mxu0 %vm145_vm0, %v1953_v5 }
0x1415   :  { %2253 = vmatpush.xpose.msk.msrb.mxu0 %vm145_vm0, %v1952_v4 }
0x146c   :  { %v1808_v7 = vpop.xlane.xlu1 %1807 }
0x146d   :  { %v1812_v9 = vmul.f32 %v1808_v7, %v2819_v14  ;;  %v1968_v7 = vld [vmem:[%s3188_s13 + $0xb8] sm:$0xff] }
0x146f   :  { %v1814_v10 = vadd.f32 1e-05, %v1812_v9 }
0x1471   :  { %2433 = vrsqrt.f32 %v1814_v10  ;;  %vm1822_vm6 = vweird.f32 %v1814_v10 }
0x1477   :  { %v2434_v11 = vpop.eup %2433 }
0x1478   :  { %v1817_v12 = vmul.f32 %v2434_v11, %v1814_v10  ;;  %vm1823_vm5 = vweird.f32 %v2434_v11  ;;  %v1951_v10 = vld [vmem:[%s3188_s13 + $0x30] sm:$0xff] }
0x1479   :  { %vm1824_vm7 = vmor %vm1822_vm6, %vm1823_vm5  ;;  %2254 = vmatpush.xpose.msk.msrb.mxu0 %vm145_vm0, %v1951_v10 }
0x147a   :  { %v1818_v15 = vmul.f32 %v2434_v11, %v1817_v12  ;;  %v1799_v50 = vpop.xlane.xlu2 %1798  ;;  %v1950_v12 = vld [vmem:[%s3188_s13 + $0x28] sm:$0xff] }
0x147b   :  { %v1801_v16 = vmul.f32 %v1799_v50, %v2819_v14  ;;  %v1949_v50 = vld [vmem:[%s3188_s13 + $0x20] sm:$0xff] }
0x147c   :  { %v1819_v17 = vmul.f32 0.5, %v1818_v15  ;;  %v1966_v15 = vld [vmem:[%s3188_s13 + $0xa8] sm:$0xff] }
0x147d   :  { %v1803_v18 = vsub.f32 %v1793_v3, %v1801_v16  ;;  %2255 = vmatpush.xpose.msk.msrb.mxu0 %vm145_vm0, %v1950_v12  ;;  %v1965_v16 = vld [vmem:[%s3188_s13 + $0xa0] sm:$0xff] }
0x147e   :  { %v1820_v19 = vsub.f32 1.5, %v1819_v17  ;;  %v1948_v17 = vld [vmem:[%s3188_s13 + $0x18] sm:$0xff] }
0x147f   :  { %v1805_v21 = vmul.f32 %v1803_v18, %v1803_v18 }
0x1480   :  { %v1821_v43 = vmul.f32 %v2434_v11, %v1820_v19  ;;  %v1947_v19 = vld [vmem:[%s3188_s13 + $0x10] sm:$0xff] }
0x1481   :  { %v1809_v23 = vsel %vm145_vm0, %v1805_v21, 0.0  ;;  %2256 = vmatpush.xpose.msk.msrb.mxu0 %vm145_vm0, %v1949_v50  ;;  %v1963_v21 = vld [vmem:[%s3188_s13 + $0x90] sm:$0xff] }
0x1482   :  { %v1825_v24 = vsel %vm1824_vm7, %v2434_v11, %v1821_v43  ;;  %1810 = vadd.xlane.f32.xlu0 %v1809_v23  ;;  %v1967_v11 = vld [vmem:[%s3188_s13 + $0xb0] sm:$0xff]  ;;  %v1946_v43 = vld [vmem:[%s3188_s13 + $0x8] sm:$0xff]  ;;  %v1945_v23 = vld [vmem:[%s3188_s13] sm:$0xff] }
0x1483   :  { %v1836_v25 = vmul.f32 %v1825_v24, %v1802_v56  ;;  %v1973_v56 = vld [vmem:[%s3188_s13 + $0xe0] sm:$0xff] }
0x1484   :  { %2266 = vmatpush.xpose.msk.msra.mxu2 %vm145_vm0, %v1973_v56  ;;  %v1961_v24 = vld [vmem:[%s3188_s13 + $0x80] sm:$0xff] }
0x1485   :  { %v1842_v27 = vmul.f32 %v2346_v22, %v1836_v25  ;;  %2257 = vmatpush.xpose.msk.msrb.mxu0 %vm145_vm0, %v1948_v17 }
0x1487   :  { %v1848_v28 = vadd.f32 %v2347_v26, %v1842_v27 }
0x1488   :  { %2267 = vmatpush.xpose.msk.msra.mxu2 %vm145_vm0, %v1972_v61 }
0x1489   :  { %2243 = vmatmul.msk.f32.vlgmr.msrb.gmra.mxu3 %vm145_vm0, %v1848_v28  ;;  %2258 = vmatpush.xpose.msk.msrb.mxu0 %vm145_vm0, %v1947_v19 }
0x148c   :  { %2268 = vmatpush.xpose.msk.msra.mxu2 %vm145_vm0, %v1971_v1 }
0x148d   :  { %2259 = vmatpush.xpose.msk.msrb.mxu0 %vm145_vm0, %v1946_v43 }
0x1490   :  { %2269 = vmatpush.xpose.msk.msra.mxu2 %vm145_vm0, %v1970_v47 }
0x1491   :  { %2260 = vmatpush.xpose.msk.msrb.mxu0 %vm145_vm0, %v1945_v23 }
0x1494   :  { %2270 = vmatpush.xpose.msk.msra.mxu2 %vm145_vm0, %v1969_v6 }
0x1498   :  { %2271 = vmatpush.xpose.msk.msra.mxu2 %vm145_vm0, %v1968_v7 }
0x149c   :  { %2272 = vmatpush.xpose.msk.msra.mxu2 %vm145_vm0, %v1967_v11 }
0x14a0   :  { %2273 = vmatpush.xpose.msk.msra.mxu2 %vm145_vm0, %v1966_v15 }
0x14a4   :  { %2274 = vmatpush.xpose.msk.msra.mxu2 %vm145_vm0, %v1965_v16 }
0x14f5   :  { %v1811_v29 = vpop.xlane.xlu0 %1810 }
0x14f6   :  { %v1813_v30 = vmul.f32 %v1811_v29, %v2819_v14 }
0x14f8   :  { %v1815_v31 = vadd.f32 1e-05, %v1813_v30 }
0x14fa   :  { %2435 = vrsqrt.f32 %v1815_v31  ;;  %vm1832_vm2 = vweird.f32 %v1815_v31 }
0x1500   :  { %v2436_v32 = vpop.eup %2435 }
0x1501   :  { %v1827_v33 = vmul.f32 %v2436_v32, %v1815_v31  ;;  %vm1833_vm1 = vweird.f32 %v2436_v32 }
0x1502   :  { %vm1834_vm3 = vmor %vm1832_vm2, %vm1833_vm1 }
0x1503   :  { %v1828_v13 = vmul.f32 %v2436_v32, %v1827_v33 }
0x1505   :  { %v1829_v34 = vmul.f32 0.5, %v1828_v13 }
0x1507   :  { %v1830_v35 = vsub.f32 1.5, %v1829_v34 }
0x1509   :  { %v1831_v36 = vmul.f32 %v2436_v32, %v1830_v35 }
0x150b   :  { %v1835_v38 = vsel %vm1834_vm3, %v2436_v32, %v1831_v36 }
0x150c   :  { %v1881_v39 = vpop.f32.mrf.mxu3  ;;  %v1837_v40 = vmul.f32 %v1835_v38, %v1803_v18  ;;  %v1964_v18 = vld [vmem:[%s3188_s13 + $0x98] sm:$0xff] }
0x150d   :  { %v1882_v41 = vadd.f32 %v2348_v37, %v1881_v39  ;;  %2275 = vmatpush.xpose.msk.msra.mxu2 %vm145_vm0, %v1964_v18 }
0x150e   :  { %v1843_v42 = vmul.f32 %v2346_v22, %v1837_v40  ;;  %v1962_v22 = vld [vmem:[%s3188_s13 + $0x88] sm:$0xff] }
0x150f   :  { %v1887_v20 = vmax.f32 %v1882_v41, 0.0  ;;  %v2350_v41 = vld [vmem:[%s2679_s20] ss:$0 sm:$0xff] }
0x1510   :  { %v1849_v44 = vadd.f32 %v2347_v26, %v1843_v42 }
0x1511   :  { %v1889_v45 = vsel %vm145_vm0, %v1887_v20, 0.0  ;;  %2276 = vmatpush.xpose.msk.msra.mxu2 %vm145_vm0, %v1963_v21 }
0x1512   :  { %1890 = vadd.xlane.f32.xlu2 %v1889_v45  ;;  %2244 = vmatmul.msk.f32.gmra.mxu3 %vm145_vm0, %v1849_v44 }
0x1515   :  { %2277 = vmatpush.xpose.msk.msra.mxu2 %vm145_vm0, %v1962_v22 }
0x1519   :  { %2278 = vmatpush.xpose.msk.msra.mxu2 %vm145_vm0, %v1961_v24 }
0x1585   :  { %v1891_v54 = vpop.xlane.xlu2 %1890 }
0x1586   :  { %v1895_v57 = vmul.f32 %v1891_v54, %v2819_v14 }
0x1588   :  { %v3082_v59 = vsub.f32 %v1887_v20, %v1895_v57 }
0x158a   :  { %v1899_v62 = vmul.f32 %v3082_v59, %v3082_v59 }
0x158c   :  { %v1901_v63 = vsel %vm145_vm0, %v1899_v62, 0.0 }
0x158d   :  { %1902 = vadd.xlane.f32.xlu0 %v1901_v63 }
0x1595   :  { %v1884_v3 = vpop.f32.mrf.mxu3 }
0x1596   :  { %v1885_v58 = vadd.f32 %v2348_v37, %v1884_v3  ;;  %v2349_v37 = vld [vmem:[%s2674_s9] ss:$0 sm:$0xff]  ;;  %s2514_s9 = smov [#allocation3]  }
0x1597   :  { %s2133_s20 = sshll.u32 %s2514_s9, 4  ;;  %s2134_s20 = int_to_ptr.vmem [resolvable:$true] %s2133_s20 }
0x1598   :  { %v1888_v8 = vmax.f32 %v1885_v58, 0.0 }
0x159a   :  { %v1892_v9 = vsel %vm145_vm0, %v1888_v8, 0.0 }
0x159b   :  { %1893 = vadd.xlane.f32.xlu1 %v1892_v9 }
0x1600   :  { %v1903_v25 = vpop.xlane.xlu0 %1902 }
0x1601   :  { %v1907_v26 = vmul.f32 %v1903_v25, %v2819_v14 }
0x1603   :  { %v1909_v27 = vadd.f32 1e-05, %v1907_v26 }
0x1605   :  { %2437 = vrsqrt.f32 %v1909_v27  ;;  %vm1917_vm8 = vweird.f32 %v1909_v27 }
0x160b   :  { %v2438_v28 = vpop.eup %2437 }
0x160c   :  { %v1912_v29 = vmul.f32 %v2438_v28, %v1909_v27  ;;  %vm1918_vm4 = vweird.f32 %v2438_v28 }
0x160d   :  { %vm1919_vm10 = vmor %vm1917_vm8, %vm1918_vm4 }
0x160e   :  { %v1913_v30 = vmul.f32 %v2438_v28, %v1912_v29  ;;  %v1894_v31 = vpop.xlane.xlu1 %1893 }
0x160f   :  { %v1896_v32 = vmul.f32 %v1894_v31, %v2819_v14 }
0x1610   :  { %v1914_v33 = vmul.f32 0.5, %v1913_v30 }
0x1611   :  { %v1898_v13 = vsub.f32 %v1888_v8, %v1896_v32 }
0x1612   :  { %v1915_v34 = vsub.f32 1.5, %v1914_v33 }
0x1613   :  { %v1900_v35 = vmul.f32 %v1898_v13, %v1898_v13 }
0x1614   :  { %v1916_v36 = vmul.f32 %v2438_v28, %v1915_v34 }
0x1615   :  { %v1904_v38 = vsel %vm145_vm0, %v1900_v35, 0.0 }
0x1616   :  { %v1920_v39 = vsel %vm1919_vm10, %v2438_v28, %v1916_v36  ;;  %1905 = vadd.xlane.f32.xlu2 %v1904_v38 }
0x1617   :  { %v1931_v40 = vmul.f32 %v1920_v39, %v3082_v59 }
0x1619   :  { %v1937_v42 = vmul.f32 %v2349_v37, %v1931_v40 }
0x161b   :  { %v1943_v20 = vadd.f32 %v2350_v41, %v1937_v42 }
0x161d   :  { %2261 = vmatmul.msk.f32.vlgmr.msrb.gmra.mxu0 %vm145_vm0, %v1943_v20  ;;  %2279 = vmatmul.msk.f32.vlgmr.msra.gmra.mxu2 %vm145_vm0, %v1943_v20 }
0x1689   :  { %v1906_v44 = vpop.xlane.xlu2 %1905 }
0x168a   :  { %v1908_v45 = vmul.f32 %v1906_v44, %v2819_v14 }
0x168c   :  { %v1910_v46 = vadd.f32 1e-05, %v1908_v45 }
0x168e   :  { %2439 = vrsqrt.f32 %v1910_v46  ;;  %vm1927_vm11 = vweird.f32 %v1910_v46 }
0x1694   :  { %v2440_v48 = vpop.eup %2439 }
0x1695   :  { %v1922_v49 = vmul.f32 %v2440_v48, %v1910_v46  ;;  %vm1928_vm9 = vweird.f32 %v2440_v48 }
0x1696   :  { %vm1929_vm12 = vmor %vm1927_vm11, %vm1928_vm9 }
0x1697   :  { %v1923_v51 = vmul.f32 %v2440_v48, %v1922_v49 }
0x1699   :  { %v1924_v52 = vmul.f32 0.5, %v1923_v51 }
0x169a   :  { %v2096_v53 = vpop.f32.mrf.mxu0 }
0x169b   :  { %v1925_v54 = vsub.f32 1.5, %v1924_v52  ;;  %2125 = vst [vmem:[#allocation3] sm:$0xff] %v2096_v53 }
0x169d   :  { %v1926_v55 = vmul.f32 %v2440_v48, %v1925_v54 }
0x169f   :  { %v1930_v56 = vsel %vm1929_vm12, %v2440_v48, %v1926_v55 }
0x16a0   :  { %v2119_v57 = vpop.f32.mrf.mxu2  ;;  %v1932_v59 = vmul.f32 %v1930_v56, %v1898_v13 }
0x16a1   :  { %2126 = vst [vmem:[#allocation3 + $0x8] sm:$0xff] %v2119_v57 }
0x16a2   :  { %v1938_v60 = vmul.f32 %v2349_v37, %v1932_v59 }
0x16a4   :  { %v1944_v14 = vadd.f32 %v2350_v41, %v1938_v60 }
0x16a6   :  { %2262 = vmatmul.msk.f32.gmra.mxu0 %vm145_vm0, %v1944_v14  ;;  %2280 = vmatmul.msk.f32.gmra.mxu2 %vm145_vm0, %v1944_v14 }
0x1723   :  { %v2099_v61 = vpop.f32.mrf.mxu0 }
0x1724   :  { %2127 = vst [vmem:[#allocation3 + $0x10] sm:$0xff] %v2099_v61 }
0x1729   :  { %v2122_v62 = vpop.f32.mrf.mxu2 }
0x172a   :  { %2128 = vst [vmem:[#allocation3 + $0x18] sm:$0xff] %v2122_v62 }
0x172b   :  { %2464 = shalt.err (!%p2461_p4)
}
0x172c   :  { %s2515_s5 = smov 256  }
0x172d   :  { %2141 = dma.vmem_to_hbm [thread:$0]  %s2134_s20, 512, %s2136_s4, [#allocation4], %s2515_s5, %s2515_s5, %s2510_s16  }
0x172e   :  { %2465 = dma.done.wait [#allocation4], 512  }
0x172f   :  { %2466 = vsyncadd [#allocation4], 4294966784 }
0x1730   :  { %2146 = vsyncpa [#allocation4], 1 }

</bundles_post_ra>
